<compile_context>
chip_gen: v7x
topology: tpu7x:2x2x1
jax: 0.10.0
libtpu: 0.0.40
codegen_flags: <defaults>
</compile_context>

<pallas_src>
import functools

import jax
import jax.numpy as jnp
from jax.experimental import pallas as pl
from jax.experimental.pallas import tpu as pltpu

# ----------------------------- model config ---------------------------------
B, S, H = 2, 8, 128          # batch, sequence length, hidden size
NH, DH = 4, 32               # num heads, head dim (NH * DH == H)
FFN = 256                    # intermediate (feed-forward) size
NUM_LAYERS = 2
VOCAB = 100
TYPE_VOCAB = 2
MAX_POS = 16
EPS = 1e-12                  # BERT LayerNorm eps
BS = B * S                   # flattened tokens


# ----------------------------- in-kernel helpers ----------------------------
def _layer_norm(x, g, b):
    mu = jnp.mean(x, axis=-1, keepdims=True)
    var = jnp.mean((x - mu) ** 2, axis=-1, keepdims=True)
    return (x - mu) * jax.lax.rsqrt(var + EPS) * g + b


def _gelu(x):
    # TODO(synk): HF BERT uses erf-based gelu; tanh approximation used here.
    c = 0.7978845608028654  # sqrt(2/pi)
    return 0.5 * x * (1.0 + jnp.tanh(c * (x + 0.044715 * x * x * x)))


# ----------------------------- fused kernel ----------------------------------
def fused_bert_kernel(x_emb_ref, mask_ref, embg_ref, embb_ref,
                      wqkv_ref, bqkv_ref, wo_ref, bo_ref, ln1g_ref, ln1b_ref,
                      w1_ref, b1_ref, w2_ref, b2_ref, ln2g_ref, ln2b_ref,
                      wp_ref, bp_ref,
                      out_ref,
                      x_vmem, ctx_vmem):
    l = pl.program_id(0)

    # ---- layer 0: embedding LayerNorm into the resident activation scratch ----
    @pl.when(l == 0)
    def _():
        x_vmem[...] = _layer_norm(x_emb_ref[...], embg_ref[...], embb_ref[...])

    x = x_vmem[...]                                   # [BS, H] f32
    x_bf = x.astype(jnp.bfloat16)

    # ---- fused QKV projection: [BS, H] @ [H, 3H] ----
    qkv = jnp.dot(x_bf, wqkv_ref[0],
                  preferred_element_type=jnp.float32) + bqkv_ref[0]   # [BS, 3H] f32
    q = qkv[:, 0:H]
    k = qkv[:, H:2 * H]
    v = qkv[:, 2 * H:3 * H]

    scale = 1.0 / jnp.sqrt(jnp.float32(DH))
    mask = mask_ref[...]                              # [BS, BS] additive (0 / -1e9)

    # ---- attention, per head (static unroll), packed over batch via the mask ----
    for h in range(NH):
        sl = slice(h * DH, (h + 1) * DH)
        qh = q[:, sl].astype(jnp.bfloat16)            # [BS, DH]
        kh = k[:, sl].astype(jnp.bfloat16)
        vh = v[:, sl].astype(jnp.bfloat16)
        # q @ k^T without an explicit transpose (contract last dims).
        s = jax.lax.dot_general(qh, kh, (((1,), (1,)), ((), ())),
                                preferred_element_type=jnp.float32)
        s = s * scale + mask                          # [BS, BS] f32
        s = s - jnp.max(s, axis=-1, keepdims=True)
        p = jnp.exp(s)
        p = p * pl.reciprocal(jnp.sum(p, axis=-1, keepdims=True), approx=True)
        # write the head context into its lane slice of the VMEM scratch (no concat)
        ctx_vmem[:, sl] = jax.lax.dot_general(
            p.astype(jnp.bfloat16), vh, (((1,), (0,)), ((), ())),
            preferred_element_type=jnp.float32)

    ctx = ctx_vmem[...].astype(jnp.bfloat16)          # [BS, H]
    attn = jnp.dot(ctx, wo_ref[0],
                   preferred_element_type=jnp.float32) + bo_ref[0]
    h1 = _layer_norm(x + attn, ln1g_ref[0], ln1b_ref[0])

    # ---- feed-forward ----
    ff = _gelu(jnp.dot(h1.astype(jnp.bfloat16), w1_ref[0],
                       preferred_element_type=jnp.float32) + b1_ref[0])
    ff = jnp.dot(ff.astype(jnp.bfloat16), w2_ref[0],
                 preferred_element_type=jnp.float32) + b2_ref[0]
    x_new = _layer_norm(h1 + ff, ln2g_ref[0], ln2b_ref[0])
    x_vmem[...] = x_new

    # ---- last layer: pooler (dense + tanh on the [CLS] token of each sequence) ----
    @pl.when(l == NUM_LAYERS - 1)
    def _():
        cls = jnp.concatenate(
            [x_vmem[b * S:b * S + 1, :] for b in range(B)], axis=0)   # [B, H]
        pooled = jnp.tanh(
            jnp.dot(cls.astype(jnp.bfloat16), wp_ref[...],
                    preferred_element_type=jnp.float32) + bp_ref[...])
        out_ref[...] = pooled.astype(out_ref.dtype)


def fused_bert_forward(x_emb, mask2d, p):
    res2 = lambda l: (0, 0)
    per_layer = lambda l: (l, 0, 0)
    in_specs = [
        pl.BlockSpec((BS, H), res2),               # x_emb (resident, used at l==0)
        pl.BlockSpec((BS, BS), res2),              # packed additive mask
        pl.BlockSpec((1, H), res2),                # emb LN gamma
        pl.BlockSpec((1, H), res2),                # emb LN beta
        pl.BlockSpec((1, H, 3 * H), per_layer),    # wqkv
        pl.BlockSpec((1, 1, 3 * H), per_layer),    # bqkv
        pl.BlockSpec((1, H, H), per_layer),        # wo
        pl.BlockSpec((1, 1, H), per_layer),        # bo
        pl.BlockSpec((1, 1, H), per_layer),        # ln1 gamma
        pl.BlockSpec((1, 1, H), per_layer),        # ln1 beta
        pl.BlockSpec((1, H, FFN), per_layer),      # w1
        pl.BlockSpec((1, 1, FFN), per_layer),      # b1
        pl.BlockSpec((1, FFN, H), per_layer),      # w2
        pl.BlockSpec((1, 1, H), per_layer),        # b2
        pl.BlockSpec((1, 1, H), per_layer),        # ln2 gamma
        pl.BlockSpec((1, 1, H), per_layer),        # ln2 beta
        pl.BlockSpec((H, H), res2),                # pooler W
        pl.BlockSpec((1, H), res2),                # pooler b
    ]
    return pl.pallas_call(
        fused_bert_kernel,
        out_shape=jax.ShapeDtypeStruct((B, H), jnp.float32),
        grid=(NUM_LAYERS,),
        in_specs=in_specs,
        out_specs=pl.BlockSpec((B, H), res2),
        scratch_shapes=[pltpu.VMEM((BS, H), jnp.float32),   # resident activations
                        pltpu.VMEM((BS, H), jnp.float32)],  # per-layer attn context
        compiler_params=pltpu.CompilerParams(
            dimension_semantics=("arbitrary",)),
    )(x_emb, mask2d, p["emb_ln_g"], p["emb_ln_b"],
      p["wqkv"], p["bqkv"], p["wo"], p["bo"], p["ln1g"], p["ln1b"],
      p["w1"], p["b1"], p["w2"], p["b2"], p["ln2g"], p["ln2b"],
      p["pool_w"], p["pool_b"])


# ----------------------------- parameters ------------------------------------
def init_params(key):
    # TODO(synk): AutoModel.from_pretrained weights cannot be loaded in-script;
    # a deterministic random BERT of the same structure is used instead.
    def normal(k, shape, scale=0.02):
        return scale * jax.random.normal(k, shape, jnp.float32)

    ks = jax.random.split(key, 8)
    return {
        "word_emb": normal(ks[0], (VOCAB, H)),
        "pos_emb": normal(ks[1], (MAX_POS, H)),
        "type_emb": normal(ks[2], (TYPE_VOCAB, H)),
        "emb_ln_g": jnp.ones((1, H), jnp.float32),
        "emb_ln_b": jnp.zeros((1, H), jnp.float32),
        "pool_w": normal(ks[3], (H, H)).astype(jnp.bfloat16),
        "pool_b": jnp.zeros((1, H), jnp.float32),
        # per-layer weights stacked along a leading NUM_LAYERS axis;
        # matmul weights in bf16 (f32 accumulation in-kernel), everything else f32.
        "wqkv": normal(ks[4], (NUM_LAYERS, H, 3 * H)).astype(jnp.bfloat16),
        "bqkv": jnp.zeros((NUM_LAYERS, 1, 3 * H), jnp.float32),
        "wo": normal(ks[5], (NUM_LAYERS, H, H)).astype(jnp.bfloat16),
        "bo": jnp.zeros((NUM_LAYERS, 1, H), jnp.float32),
        "ln1g": jnp.ones((NUM_LAYERS, 1, H), jnp.float32),
        "ln1b": jnp.zeros((NUM_LAYERS, 1, H), jnp.float32),
        "w1": normal(ks[6], (NUM_LAYERS, H, FFN)).astype(jnp.bfloat16),
        "b1": jnp.zeros((NUM_LAYERS, 1, FFN), jnp.float32),
        "w2": normal(ks[7], (NUM_LAYERS, FFN, H)).astype(jnp.bfloat16),
        "b2": jnp.zeros((NUM_LAYERS, 1, H), jnp.float32),
        "ln2g": jnp.ones((NUM_LAYERS, 1, H), jnp.float32),
        "ln2b": jnp.zeros((NUM_LAYERS, 1, H), jnp.float32),
    }


# ----------------------------- forward ----------------------------------------
@functools.partial(jax.jit, static_argnums=())
def transformer_encoder_forward(params, input_ids, attention_mask):
    # --- embeddings (gathers are JAX glue; everything else is one fused kernel) ---
    word = jnp.take(params["word_emb"], input_ids, axis=0)           # [B,S,H]
    pos = params["pos_emb"][:S][None]                                # [1,S,H]
    typ = params["type_emb"][0][None, None, :]                       # token_type_ids = 0
    x_emb = (word + pos + typ).reshape(BS, H)                        # [B*S, H]

    # Packed block-diagonal additive mask in the flattened [B*S, B*S] score space:
    # 0 where (same batch AND key not padded), -1e9 otherwise (f32 mask, f32 softmax).
    key_keep = attention_mask.astype(jnp.float32)                    # [B,S]
    keep = jnp.eye(B, dtype=jnp.float32)[:, :, None] * key_keep[None]  # [Bq,Bk,Sk]
    keep = jnp.broadcast_to(keep[:, None, :, :], (B, S, B, S))
    mask2d = (1.0 - keep.reshape(BS, BS)) * -1e9

    # pooler_output
    return fused_bert_forward(x_emb, mask2d, params)


if __name__ == "__main__":
    key = jax.random.PRNGKey(0)
    k_param, k_ids = jax.random.split(key)
    params = init_params(k_param)

    # model_input = {"input_ids": ..., "attention_mask": ...}
    input_ids = jax.random.randint(k_ids, (B, S), 0, VOCAB, dtype=jnp.int32)
    attention_mask = jnp.ones((B, S), jnp.float32)

    out = transformer_encoder_forward(params, input_ids, attention_mask)
    out = jax.block_until_ready(out)

    assert out.shape == (B, H), out.shape
    assert bool(jnp.all(jnp.isfinite(out)))
    print("KERNEL_OK")
</pallas_src>

<mosaic_0001>
module attributes {stable_mosaic.version = 11 : i64} {
  func.func @fused_bert_kernel(%arg0: i32, %arg1: memref<16x128xf32, #tpu.memory_space<vmem>>, %arg2: memref<16x16xf32, #tpu.memory_space<vmem>>, %arg3: memref<1x128xf32, #tpu.memory_space<vmem>>, %arg4: memref<1x128xf32, #tpu.memory_space<vmem>>, %arg5: memref<1x128x384xbf16, #tpu.memory_space<vmem>>, %arg6: memref<1x1x384xf32, #tpu.memory_space<vmem>>, %arg7: memref<1x128x128xbf16, #tpu.memory_space<vmem>>, %arg8: memref<1x1x128xf32, #tpu.memory_space<vmem>>, %arg9: memref<1x1x128xf32, #tpu.memory_space<vmem>>, %arg10: memref<1x1x128xf32, #tpu.memory_space<vmem>>, %arg11: memref<1x128x256xbf16, #tpu.memory_space<vmem>>, %arg12: memref<1x1x256xf32, #tpu.memory_space<vmem>>, %arg13: memref<1x256x128xbf16, #tpu.memory_space<vmem>>, %arg14: memref<1x1x128xf32, #tpu.memory_space<vmem>>, %arg15: memref<1x1x128xf32, #tpu.memory_space<vmem>>, %arg16: memref<1x1x128xf32, #tpu.memory_space<vmem>>, %arg17: memref<128x128xbf16, #tpu.memory_space<vmem>>, %arg18: memref<1x128xf32, #tpu.memory_space<vmem>>, %arg19: memref<2x128xf32, #tpu.memory_space<vmem>>, %arg20: memref<16x128xf32, #tpu.memory_space<vmem>>, %arg21: memref<16x128xf32, #tpu.memory_space<vmem>>) attributes {dimension_semantics = [#tpu.dimension_semantics<arbitrary>], iteration_bounds = array<i64: 2>, scalar_prefetch = 0 : i64, scratch_operands = 2 : i64, tpu.core_type = #tpu.core_type<tc>, window_params = [{pipeline_mode = #tpu.pipeline_mode<synchronous>, transform_indices = @transform_0, window_bounds = array<i64: 16, 128>}, {pipeline_mode = #tpu.pipeline_mode<synchronous>, transform_indices = @transform_1, window_bounds = array<i64: 16, 16>}, {pipeline_mode = #tpu.pipeline_mode<synchronous>, transform_indices = @transform_2, window_bounds = array<i64: 1, 128>}, {pipeline_mode = #tpu.pipeline_mode<synchronous>, transform_indices = @transform_3, window_bounds = array<i64: 1, 128>}, {transform_indices = @transform_4, window_bounds = array<i64: 1, 128, 384>}, {transform_indices = @transform_5, window_bounds = array<i64: 1, 1, 384>}, {transform_indices = @transform_6, window_bounds = array<i64: 1, 128, 128>}, {transform_indices = @transform_7, window_bounds = array<i64: 1, 1, 128>}, {transform_indices = @transform_8, window_bounds = array<i64: 1, 1, 128>}, {transform_indices = @transform_9, window_bounds = array<i64: 1, 1, 128>}, {transform_indices = @transform_10, window_bounds = array<i64: 1, 128, 256>}, {transform_indices = @transform_11, window_bounds = array<i64: 1, 1, 256>}, {transform_indices = @transform_12, window_bounds = array<i64: 1, 256, 128>}, {transform_indices = @transform_13, window_bounds = array<i64: 1, 1, 128>}, {transform_indices = @transform_14, window_bounds = array<i64: 1, 1, 128>}, {transform_indices = @transform_15, window_bounds = array<i64: 1, 1, 128>}, {pipeline_mode = #tpu.pipeline_mode<synchronous>, transform_indices = @transform_16, window_bounds = array<i64: 128, 128>}, {pipeline_mode = #tpu.pipeline_mode<synchronous>, transform_indices = @transform_17, window_bounds = array<i64: 1, 128>}, {pipeline_mode = #tpu.pipeline_mode<synchronous>, transform_indices = @transform_18, window_bounds = array<i64: 2, 128>}]} {
    %c0_i32 = arith.constant 0 : i32
    %0 = arith.cmpi eq, %arg0, %c0_i32 : i32
    %1 = arith.extui %0 : i1 to i32
    %c0_i32_0 = arith.constant 0 : i32
    %2 = arith.cmpi ne, %1, %c0_i32_0 : i32
    scf.if %2 {
      %c0_85 = arith.constant 0 : index
      %c0_86 = arith.constant 0 : index
      %206 = vector.load %arg1[%c0_85, %c0_86] : memref<16x128xf32, #tpu.memory_space<vmem>>, vector<16x128xf32>
      %c0_87 = arith.constant 0 : index
      %c0_88 = arith.constant 0 : index
      %207 = vector.load %arg3[%c0_87, %c0_88] : memref<1x128xf32, #tpu.memory_space<vmem>>, vector<1x128xf32>
      %c0_89 = arith.constant 0 : index
      %c0_90 = arith.constant 0 : index
      %208 = vector.load %arg4[%c0_89, %c0_90] : memref<1x128xf32, #tpu.memory_space<vmem>>, vector<1x128xf32>
      %cst_91 = arith.constant dense<0.000000e+00> : vector<16xf32>
      %209 = vector.multi_reduction <add>, %206, %cst_91 [1] : vector<16x128xf32> to vector<16xf32>
      %210 = vector.shape_cast %209 : vector<16xf32> to vector<16x1xf32>
      %cst_92 = arith.constant 1.280000e+02 : f32
      %211 = vector.broadcast %cst_92 : f32 to vector<16x1xf32>
      %212 = arith.divf %210, %211 : vector<16x1xf32>
      %213 = vector.broadcast %212 : vector<16x1xf32> to vector<16x128xf32>
      %214 = arith.subf %206, %213 : vector<16x128xf32>
      %215 = arith.mulf %214, %214 : vector<16x128xf32>
      %cst_93 = arith.constant dense<0.000000e+00> : vector<16xf32>
      %216 = vector.multi_reduction <add>, %215, %cst_93 [1] : vector<16x128xf32> to vector<16xf32>
      %217 = vector.shape_cast %216 : vector<16xf32> to vector<16x1xf32>
      %cst_94 = arith.constant 1.280000e+02 : f32
      %218 = vector.broadcast %cst_94 : f32 to vector<16x1xf32>
      %219 = arith.divf %217, %218 : vector<16x1xf32>
      %220 = vector.broadcast %212 : vector<16x1xf32> to vector<16x128xf32>
      %221 = arith.subf %206, %220 : vector<16x128xf32>
      %cst_95 = arith.constant 9.99999996E-13 : f32
      %222 = vector.broadcast %cst_95 : f32 to vector<16x1xf32>
      %223 = arith.addf %219, %222 : vector<16x1xf32>
      %224 = math.rsqrt %223 : vector<16x1xf32>
      %225 = vector.broadcast %224 : vector<16x1xf32> to vector<16x128xf32>
      %226 = arith.mulf %221, %225 : vector<16x128xf32>
      %227 = vector.broadcast %207 : vector<1x128xf32> to vector<16x128xf32>
      %228 = arith.mulf %226, %227 : vector<16x128xf32>
      %229 = vector.broadcast %208 : vector<1x128xf32> to vector<16x128xf32>
      %230 = arith.addf %228, %229 : vector<16x128xf32>
      %c0_96 = arith.constant 0 : index
      %c0_97 = arith.constant 0 : index
      %231 = vector.load %arg20[%c0_96, %c0_97] : memref<16x128xf32, #tpu.memory_space<vmem>>, vector<16x128xf32>
      tpu.vector_store %arg20[%c0_96, %c0_97], %230 {strides = array<i32>} : memref<16x128xf32, #tpu.memory_space<vmem>>, vector<16x128xf32>,
    } else {
    }
    %c0 = arith.constant 0 : index
    %c0_1 = arith.constant 0 : index
    %3 = vector.load %arg20[%c0, %c0_1] : memref<16x128xf32, #tpu.memory_space<vmem>>, vector<16x128xf32>
    %4 = arith.truncf %3 : vector<16x128xf32> to vector<16x128xbf16>
    %c0_2 = arith.constant 0 : index
    %c0_3 = arith.constant 0 : index
    %c0_4 = arith.constant 0 : index
    %5 = vector.load %arg5[%c0_2, %c0_3, %c0_4] : memref<1x128x384xbf16, #tpu.memory_space<vmem>>, vector<1x128x384xbf16>
    %6 = vector.shape_cast %5 : vector<1x128x384xbf16> to vector<128x384xbf16>
    %cst = arith.constant dense<0.000000e+00> : vector<16x384xf32>
    %7 = tpu.matmul %4, %6, %cst {dimension_numbers = #tpu.dot_dimension_numbers<[1], [0], [0], [1], [0, 0, 1, 1], [], []>} : vector<16x128xbf16>, vector<128x384xbf16>, vector<16x384xf32> -> vector<16x384xf32>
    %c0_5 = arith.constant 0 : index
    %c0_6 = arith.constant 0 : index
    %c0_7 = arith.constant 0 : index
    %8 = vector.load %arg6[%c0_5, %c0_6, %c0_7] : memref<1x1x384xf32, #tpu.memory_space<vmem>>, vector<1x1x384xf32>
    %9 = vector.shape_cast %8 : vector<1x1x384xf32> to vector<1x384xf32>
    %10 = vector.broadcast %9 : vector<1x384xf32> to vector<16x384xf32>
    %11 = arith.addf %7, %10 : vector<16x384xf32>
    %12 = vector.extract_strided_slice %11 {offsets = [0, 0], sizes = [16, 128], strides = [1, 1]} : vector<16x384xf32> to vector<16x128xf32>
    %13 = vector.extract_strided_slice %11 {offsets = [0, 128], sizes = [16, 128], strides = [1, 1]} : vector<16x384xf32> to vector<16x128xf32>
    %14 = vector.extract_strided_slice %11 {offsets = [0, 256], sizes = [16, 128], strides = [1, 1]} : vector<16x384xf32> to vector<16x128xf32>
    %cst_8 = arith.constant 3.200000e+01 : f32
    %15 = math.sqrt %cst_8 : f32
    %cst_9 = arith.constant 1.000000e+00 : f32
    %16 = arith.divf %cst_9, %15 : f32
    %c0_10 = arith.constant 0 : index
    %c0_11 = arith.constant 0 : index
    %17 = vector.load %arg2[%c0_10, %c0_11] : memref<16x16xf32, #tpu.memory_space<vmem>>, vector<16x16xf32>
    %18 = vector.extract_strided_slice %12 {offsets = [0, 0], sizes = [16, 32], strides = [1, 1]} : vector<16x128xf32> to vector<16x32xf32>
    %19 = arith.truncf %18 : vector<16x32xf32> to vector<16x32xbf16>
    %20 = vector.extract_strided_slice %13 {offsets = [0, 0], sizes = [16, 32], strides = [1, 1]} : vector<16x128xf32> to vector<16x32xf32>
    %21 = arith.truncf %20 : vector<16x32xf32> to vector<16x32xbf16>
    %22 = vector.extract_strided_slice %14 {offsets = [0, 0], sizes = [16, 32], strides = [1, 1]} : vector<16x128xf32> to vector<16x32xf32>
    %23 = arith.truncf %22 : vector<16x32xf32> to vector<16x32xbf16>
    %cst_12 = arith.constant dense<0.000000e+00> : vector<16x16xf32>
    %24 = tpu.matmul %19, %21, %cst_12 {dimension_numbers = #tpu.dot_dimension_numbers<[1], [1], [0], [0], [0, 0, 1, 0], [], []>} : vector<16x32xbf16>, vector<16x32xbf16>, vector<16x16xf32> -> vector<16x16xf32>
    %25 = vector.broadcast %16 : f32 to vector<16x16xf32>
    %26 = arith.mulf %24, %25 : vector<16x16xf32>
    %27 = arith.addf %26, %17 : vector<16x16xf32>
    %cst_13 = arith.constant dense<0xFF800000> : vector<16xf32>
    %28 = vector.multi_reduction <maximumf>, %27, %cst_13 [1] : vector<16x16xf32> to vector<16xf32>
    %29 = vector.shape_cast %28 : vector<16xf32> to vector<16x1xf32>
    %30 = vector.broadcast %29 : vector<16x1xf32> to vector<16x16xf32>
    %31 = arith.subf %27, %30 : vector<16x16xf32>
    %32 = math.exp %31 : vector<16x16xf32>
    %cst_14 = arith.constant dense<0.000000e+00> : vector<16xf32>
    %33 = vector.multi_reduction <add>, %32, %cst_14 [1] : vector<16x16xf32> to vector<16xf32>
    %34 = vector.shape_cast %33 : vector<16xf32> to vector<16x1xf32>
    %35 = tpu.reciprocal %34 {approx = true} : vector<16x1xf32> -> vector<16x1xf32>
    %36 = vector.broadcast %35 : vector<16x1xf32> to vector<16x16xf32>
    %37 = arith.mulf %32, %36 : vector<16x16xf32>
    %38 = arith.truncf %37 : vector<16x16xf32> to vector<16x16xbf16>
    %cst_15 = arith.constant dense<0.000000e+00> : vector<16x32xf32>
    %39 = tpu.matmul %38, %23, %cst_15 {dimension_numbers = #tpu.dot_dimension_numbers<[1], [0], [0], [1], [0, 0, 1, 1], [], []>} : vector<16x16xbf16>, vector<16x32xbf16>, vector<16x32xf32> -> vector<16x32xf32>
    %c0_16 = arith.constant 0 : index
    %c0_17 = arith.constant 0 : index
    %40 = vector.load %arg21[%c0_16, %c0_17] : memref<16x128xf32, #tpu.memory_space<vmem>>, vector<16x32xf32>
    tpu.vector_store %arg21[%c0_16, %c0_17], %39 {strides = array<i32>} : memref<16x128xf32, #tpu.memory_space<vmem>>, vector<16x32xf32>,
    %41 = vector.extract_strided_slice %12 {offsets = [0, 32], sizes = [16, 32], strides = [1, 1]} : vector<16x128xf32> to vector<16x32xf32>
    %42 = arith.truncf %41 : vector<16x32xf32> to vector<16x32xbf16>
    %43 = vector.extract_strided_slice %13 {offsets = [0, 32], sizes = [16, 32], strides = [1, 1]} : vector<16x128xf32> to vector<16x32xf32>
    %44 = arith.truncf %43 : vector<16x32xf32> to vector<16x32xbf16>
    %45 = vector.extract_strided_slice %14 {offsets = [0, 32], sizes = [16, 32], strides = [1, 1]} : vector<16x128xf32> to vector<16x32xf32>
    %46 = arith.truncf %45 : vector<16x32xf32> to vector<16x32xbf16>
    %cst_18 = arith.constant dense<0.000000e+00> : vector<16x16xf32>
    %47 = tpu.matmul %42, %44, %cst_18 {dimension_numbers = #tpu.dot_dimension_numbers<[1], [1], [0], [0], [0, 0, 1, 0], [], []>} : vector<16x32xbf16>, vector<16x32xbf16>, vector<16x16xf32> -> vector<16x16xf32>
    %48 = vector.broadcast %16 : f32 to vector<16x16xf32>
    %49 = arith.mulf %47, %48 : vector<16x16xf32>
    %50 = arith.addf %49, %17 : vector<16x16xf32>
    %cst_19 = arith.constant dense<0xFF800000> : vector<16xf32>
    %51 = vector.multi_reduction <maximumf>, %50, %cst_19 [1] : vector<16x16xf32> to vector<16xf32>
    %52 = vector.shape_cast %51 : vector<16xf32> to vector<16x1xf32>
    %53 = vector.broadcast %52 : vector<16x1xf32> to vector<16x16xf32>
    %54 = arith.subf %50, %53 : vector<16x16xf32>
    %55 = math.exp %54 : vector<16x16xf32>
    %cst_20 = arith.constant dense<0.000000e+00> : vector<16xf32>
    %56 = vector.multi_reduction <add>, %55, %cst_20 [1] : vector<16x16xf32> to vector<16xf32>
    %57 = vector.shape_cast %56 : vector<16xf32> to vector<16x1xf32>
    %58 = tpu.reciprocal %57 {approx = true} : vector<16x1xf32> -> vector<16x1xf32>
    %59 = vector.broadcast %58 : vector<16x1xf32> to vector<16x16xf32>
    %60 = arith.mulf %55, %59 : vector<16x16xf32>
    %61 = arith.truncf %60 : vector<16x16xf32> to vector<16x16xbf16>
    %cst_21 = arith.constant dense<0.000000e+00> : vector<16x32xf32>
    %62 = tpu.matmul %61, %46, %cst_21 {dimension_numbers = #tpu.dot_dimension_numbers<[1], [0], [0], [1], [0, 0, 1, 1], [], []>} : vector<16x16xbf16>, vector<16x32xbf16>, vector<16x32xf32> -> vector<16x32xf32>
    %c0_22 = arith.constant 0 : index
    %c32 = arith.constant 32 : index
    %63 = vector.load %arg21[%c0_22, %c32] : memref<16x128xf32, #tpu.memory_space<vmem>>, vector<16x32xf32>
    tpu.vector_store %arg21[%c0_22, %c32], %62 {strides = array<i32>} : memref<16x128xf32, #tpu.memory_space<vmem>>, vector<16x32xf32>,
    %64 = vector.extract_strided_slice %12 {offsets = [0, 64], sizes = [16, 32], strides = [1, 1]} : vector<16x128xf32> to vector<16x32xf32>
    %65 = arith.truncf %64 : vector<16x32xf32> to vector<16x32xbf16>
    %66 = vector.extract_strided_slice %13 {offsets = [0, 64], sizes = [16, 32], strides = [1, 1]} : vector<16x128xf32> to vector<16x32xf32>
    %67 = arith.truncf %66 : vector<16x32xf32> to vector<16x32xbf16>
    %68 = vector.extract_strided_slice %14 {offsets = [0, 64], sizes = [16, 32], strides = [1, 1]} : vector<16x128xf32> to vector<16x32xf32>
    %69 = arith.truncf %68 : vector<16x32xf32> to vector<16x32xbf16>
    %cst_23 = arith.constant dense<0.000000e+00> : vector<16x16xf32>
    %70 = tpu.matmul %65, %67, %cst_23 {dimension_numbers = #tpu.dot_dimension_numbers<[1], [1], [0], [0], [0, 0, 1, 0], [], []>} : vector<16x32xbf16>, vector<16x32xbf16>, vector<16x16xf32> -> vector<16x16xf32>
    %71 = vector.broadcast %16 : f32 to vector<16x16xf32>
    %72 = arith.mulf %70, %71 : vector<16x16xf32>
    %73 = arith.addf %72, %17 : vector<16x16xf32>
    %cst_24 = arith.constant dense<0xFF800000> : vector<16xf32>
    %74 = vector.multi_reduction <maximumf>, %73, %cst_24 [1] : vector<16x16xf32> to vector<16xf32>
    %75 = vector.shape_cast %74 : vector<16xf32> to vector<16x1xf32>
    %76 = vector.broadcast %75 : vector<16x1xf32> to vector<16x16xf32>
    %77 = arith.subf %73, %76 : vector<16x16xf32>
    %78 = math.exp %77 : vector<16x16xf32>
    %cst_25 = arith.constant dense<0.000000e+00> : vector<16xf32>
    %79 = vector.multi_reduction <add>, %78, %cst_25 [1] : vector<16x16xf32> to vector<16xf32>
    %80 = vector.shape_cast %79 : vector<16xf32> to vector<16x1xf32>
    %81 = tpu.reciprocal %80 {approx = true} : vector<16x1xf32> -> vector<16x1xf32>
    %82 = vector.broadcast %81 : vector<16x1xf32> to vector<16x16xf32>
    %83 = arith.mulf %78, %82 : vector<16x16xf32>
    %84 = arith.truncf %83 : vector<16x16xf32> to vector<16x16xbf16>
    %cst_26 = arith.constant dense<0.000000e+00> : vector<16x32xf32>
    %85 = tpu.matmul %84, %69, %cst_26 {dimension_numbers = #tpu.dot_dimension_numbers<[1], [0], [0], [1], [0, 0, 1, 1], [], []>} : vector<16x16xbf16>, vector<16x32xbf16>, vector<16x32xf32> -> vector<16x32xf32>
    %c0_27 = arith.constant 0 : index
    %c64 = arith.constant 64 : index
    %86 = vector.load %arg21[%c0_27, %c64] : memref<16x128xf32, #tpu.memory_space<vmem>>, vector<16x32xf32>
    tpu.vector_store %arg21[%c0_27, %c64], %85 {strides = array<i32>} : memref<16x128xf32, #tpu.memory_space<vmem>>, vector<16x32xf32>,
    %87 = vector.extract_strided_slice %12 {offsets = [0, 96], sizes = [16, 32], strides = [1, 1]} : vector<16x128xf32> to vector<16x32xf32>
    %88 = arith.truncf %87 : vector<16x32xf32> to vector<16x32xbf16>
    %89 = vector.extract_strided_slice %13 {offsets = [0, 96], sizes = [16, 32], strides = [1, 1]} : vector<16x128xf32> to vector<16x32xf32>
    %90 = arith.truncf %89 : vector<16x32xf32> to vector<16x32xbf16>
    %91 = vector.extract_strided_slice %14 {offsets = [0, 96], sizes = [16, 32], strides = [1, 1]} : vector<16x128xf32> to vector<16x32xf32>
    %92 = arith.truncf %91 : vector<16x32xf32> to vector<16x32xbf16>
    %cst_28 = arith.constant dense<0.000000e+00> : vector<16x16xf32>
    %93 = tpu.matmul %88, %90, %cst_28 {dimension_numbers = #tpu.dot_dimension_numbers<[1], [1], [0], [0], [0, 0, 1, 0], [], []>} : vector<16x32xbf16>, vector<16x32xbf16>, vector<16x16xf32> -> vector<16x16xf32>
    %94 = vector.broadcast %16 : f32 to vector<16x16xf32>
    %95 = arith.mulf %93, %94 : vector<16x16xf32>
    %96 = arith.addf %95, %17 : vector<16x16xf32>
    %cst_29 = arith.constant dense<0xFF800000> : vector<16xf32>
    %97 = vector.multi_reduction <maximumf>, %96, %cst_29 [1] : vector<16x16xf32> to vector<16xf32>
    %98 = vector.shape_cast %97 : vector<16xf32> to vector<16x1xf32>
    %99 = vector.broadcast %98 : vector<16x1xf32> to vector<16x16xf32>
    %100 = arith.subf %96, %99 : vector<16x16xf32>
    %101 = math.exp %100 : vector<16x16xf32>
    %cst_30 = arith.constant dense<0.000000e+00> : vector<16xf32>
    %102 = vector.multi_reduction <add>, %101, %cst_30 [1] : vector<16x16xf32> to vector<16xf32>
    %103 = vector.shape_cast %102 : vector<16xf32> to vector<16x1xf32>
    %104 = tpu.reciprocal %103 {approx = true} : vector<16x1xf32> -> vector<16x1xf32>
    %105 = vector.broadcast %104 : vector<16x1xf32> to vector<16x16xf32>
    %106 = arith.mulf %101, %105 : vector<16x16xf32>
    %107 = arith.truncf %106 : vector<16x16xf32> to vector<16x16xbf16>
    %cst_31 = arith.constant dense<0.000000e+00> : vector<16x32xf32>
    %108 = tpu.matmul %107, %92, %cst_31 {dimension_numbers = #tpu.dot_dimension_numbers<[1], [0], [0], [1], [0, 0, 1, 1], [], []>} : vector<16x16xbf16>, vector<16x32xbf16>, vector<16x32xf32> -> vector<16x32xf32>
    %c0_32 = arith.constant 0 : index
    %c96 = arith.constant 96 : index
    %109 = vector.load %arg21[%c0_32, %c96] : memref<16x128xf32, #tpu.memory_space<vmem>>, vector<16x32xf32>
    tpu.vector_store %arg21[%c0_32, %c96], %108 {strides = array<i32>} : memref<16x128xf32, #tpu.memory_space<vmem>>, vector<16x32xf32>,
    %c0_33 = arith.constant 0 : index
    %c0_34 = arith.constant 0 : index
    %110 = vector.load %arg21[%c0_33, %c0_34] : memref<16x128xf32, #tpu.memory_space<vmem>>, vector<16x128xf32>
    %111 = arith.truncf %110 : vector<16x128xf32> to vector<16x128xbf16>
    %c0_35 = arith.constant 0 : index
    %c0_36 = arith.constant 0 : index
    %c0_37 = arith.constant 0 : index
    %112 = vector.load %arg7[%c0_35, %c0_36, %c0_37] : memref<1x128x128xbf16, #tpu.memory_space<vmem>>, vector<1x128x128xbf16>
    %113 = vector.shape_cast %112 : vector<1x128x128xbf16> to vector<128x128xbf16>
    %cst_38 = arith.constant dense<0.000000e+00> : vector<16x128xf32>
    %114 = tpu.matmul %111, %113, %cst_38 {dimension_numbers = #tpu.dot_dimension_numbers<[1], [0], [0], [1], [0, 0, 1, 1], [], []>} : vector<16x128xbf16>, vector<128x128xbf16>, vector<16x128xf32> -> vector<16x128xf32>
    %c0_39 = arith.constant 0 : index
    %c0_40 = arith.constant 0 : index
    %c0_41 = arith.constant 0 : index
    %115 = vector.load %arg8[%c0_39, %c0_40, %c0_41] : memref<1x1x128xf32, #tpu.memory_space<vmem>>, vector<1x1x128xf32>
    %116 = vector.shape_cast %115 : vector<1x1x128xf32> to vector<1x128xf32>
    %117 = vector.broadcast %116 : vector<1x128xf32> to vector<16x128xf32>
    %118 = arith.addf %114, %117 : vector<16x128xf32>
    %119 = arith.addf %3, %118 : vector<16x128xf32>
    %c0_42 = arith.constant 0 : index
    %c0_43 = arith.constant 0 : index
    %c0_44 = arith.constant 0 : index
    %120 = vector.load %arg9[%c0_42, %c0_43, %c0_44] : memref<1x1x128xf32, #tpu.memory_space<vmem>>, vector<1x1x128xf32>
    %121 = vector.shape_cast %120 : vector<1x1x128xf32> to vector<1x128xf32>
    %c0_45 = arith.constant 0 : index
    %c0_46 = arith.constant 0 : index
    %c0_47 = arith.constant 0 : index
    %122 = vector.load %arg10[%c0_45, %c0_46, %c0_47] : memref<1x1x128xf32, #tpu.memory_space<vmem>>, vector<1x1x128xf32>
    %123 = vector.shape_cast %122 : vector<1x1x128xf32> to vector<1x128xf32>
    %cst_48 = arith.constant dense<0.000000e+00> : vector<16xf32>
    %124 = vector.multi_reduction <add>, %119, %cst_48 [1] : vector<16x128xf32> to vector<16xf32>
    %125 = vector.shape_cast %124 : vector<16xf32> to vector<16x1xf32>
    %cst_49 = arith.constant 1.280000e+02 : f32
    %126 = vector.broadcast %cst_49 : f32 to vector<16x1xf32>
    %127 = arith.divf %125, %126 : vector<16x1xf32>
    %128 = vector.broadcast %127 : vector<16x1xf32> to vector<16x128xf32>
    %129 = arith.subf %119, %128 : vector<16x128xf32>
    %130 = arith.mulf %129, %129 : vector<16x128xf32>
    %cst_50 = arith.constant dense<0.000000e+00> : vector<16xf32>
    %131 = vector.multi_reduction <add>, %130, %cst_50 [1] : vector<16x128xf32> to vector<16xf32>
    %132 = vector.shape_cast %131 : vector<16xf32> to vector<16x1xf32>
    %cst_51 = arith.constant 1.280000e+02 : f32
    %133 = vector.broadcast %cst_51 : f32 to vector<16x1xf32>
    %134 = arith.divf %132, %133 : vector<16x1xf32>
    %135 = vector.broadcast %127 : vector<16x1xf32> to vector<16x128xf32>
    %136 = arith.subf %119, %135 : vector<16x128xf32>
    %cst_52 = arith.constant 9.99999996E-13 : f32
    %137 = vector.broadcast %cst_52 : f32 to vector<16x1xf32>
    %138 = arith.addf %134, %137 : vector<16x1xf32>
    %139 = math.rsqrt %138 : vector<16x1xf32>
    %140 = vector.broadcast %139 : vector<16x1xf32> to vector<16x128xf32>
    %141 = arith.mulf %136, %140 : vector<16x128xf32>
    %142 = vector.broadcast %121 : vector<1x128xf32> to vector<16x128xf32>
    %143 = arith.mulf %141, %142 : vector<16x128xf32>
    %144 = vector.broadcast %123 : vector<1x128xf32> to vector<16x128xf32>
    %145 = arith.addf %143, %144 : vector<16x128xf32>
    %146 = arith.truncf %145 : vector<16x128xf32> to vector<16x128xbf16>
    %c0_53 = arith.constant 0 : index
    %c0_54 = arith.constant 0 : index
    %c0_55 = arith.constant 0 : index
    %147 = vector.load %arg11[%c0_53, %c0_54, %c0_55] : memref<1x128x256xbf16, #tpu.memory_space<vmem>>, vector<1x128x256xbf16>
    %148 = vector.shape_cast %147 : vector<1x128x256xbf16> to vector<128x256xbf16>
    %cst_56 = arith.constant dense<0.000000e+00> : vector<16x256xf32>
    %149 = tpu.matmul %146, %148, %cst_56 {dimension_numbers = #tpu.dot_dimension_numbers<[1], [0], [0], [1], [0, 0, 1, 1], [], []>} : vector<16x128xbf16>, vector<128x256xbf16>, vector<16x256xf32> -> vector<16x256xf32>
    %c0_57 = arith.constant 0 : index
    %c0_58 = arith.constant 0 : index
    %c0_59 = arith.constant 0 : index
    %150 = vector.load %arg12[%c0_57, %c0_58, %c0_59] : memref<1x1x256xf32, #tpu.memory_space<vmem>>, vector<1x1x256xf32>
    %151 = vector.shape_cast %150 : vector<1x1x256xf32> to vector<1x256xf32>
    %152 = vector.broadcast %151 : vector<1x256xf32> to vector<16x256xf32>
    %153 = arith.addf %149, %152 : vector<16x256xf32>
    %cst_60 = arith.constant 5.000000e-01 : f32
    %154 = vector.broadcast %cst_60 : f32 to vector<16x256xf32>
    %155 = arith.mulf %154, %153 : vector<16x256xf32>
    %cst_61 = arith.constant 4.471500e-02 : f32
    %156 = vector.broadcast %cst_61 : f32 to vector<16x256xf32>
    %157 = arith.mulf %156, %153 : vector<16x256xf32>
    %158 = arith.mulf %157, %153 : vector<16x256xf32>
    %159 = arith.mulf %158, %153 : vector<16x256xf32>
    %160 = arith.addf %153, %159 : vector<16x256xf32>
    %cst_62 = arith.constant 0.797884583 : f32
    %161 = vector.broadcast %cst_62 : f32 to vector<16x256xf32>
    %162 = arith.mulf %161, %160 : vector<16x256xf32>
    %163 = math.tanh %162 : vector<16x256xf32>
    %cst_63 = arith.constant 1.000000e+00 : f32
    %164 = vector.broadcast %cst_63 : f32 to vector<16x256xf32>
    %165 = arith.addf %164, %163 : vector<16x256xf32>
    %166 = arith.mulf %155, %165 : vector<16x256xf32>
    %167 = arith.truncf %166 : vector<16x256xf32> to vector<16x256xbf16>
    %c0_64 = arith.constant 0 : index
    %c0_65 = arith.constant 0 : index
    %c0_66 = arith.constant 0 : index
    %168 = vector.load %arg13[%c0_64, %c0_65, %c0_66] : memref<1x256x128xbf16, #tpu.memory_space<vmem>>, vector<1x256x128xbf16>
    %169 = vector.shape_cast %168 : vector<1x256x128xbf16> to vector<256x128xbf16>
    %cst_67 = arith.constant dense<0.000000e+00> : vector<16x128xf32>
    %170 = tpu.matmul %167, %169, %cst_67 {dimension_numbers = #tpu.dot_dimension_numbers<[1], [0], [0], [1], [0, 0, 1, 1], [], []>} : vector<16x256xbf16>, vector<256x128xbf16>, vector<16x128xf32> -> vector<16x128xf32>
    %c0_68 = arith.constant 0 : index
    %c0_69 = arith.constant 0 : index
    %c0_70 = arith.constant 0 : index
    %171 = vector.load %arg14[%c0_68, %c0_69, %c0_70] : memref<1x1x128xf32, #tpu.memory_space<vmem>>, vector<1x1x128xf32>
    %172 = vector.shape_cast %171 : vector<1x1x128xf32> to vector<1x128xf32>
    %173 = vector.broadcast %172 : vector<1x128xf32> to vector<16x128xf32>
    %174 = arith.addf %170, %173 : vector<16x128xf32>
    %175 = arith.addf %145, %174 : vector<16x128xf32>
    %c0_71 = arith.constant 0 : index
    %c0_72 = arith.constant 0 : index
    %c0_73 = arith.constant 0 : index
    %176 = vector.load %arg15[%c0_71, %c0_72, %c0_73] : memref<1x1x128xf32, #tpu.memory_space<vmem>>, vector<1x1x128xf32>
    %177 = vector.shape_cast %176 : vector<1x1x128xf32> to vector<1x128xf32>
    %c0_74 = arith.constant 0 : index
    %c0_75 = arith.constant 0 : index
    %c0_76 = arith.constant 0 : index
    %178 = vector.load %arg16[%c0_74, %c0_75, %c0_76] : memref<1x1x128xf32, #tpu.memory_space<vmem>>, vector<1x1x128xf32>
    %179 = vector.shape_cast %178 : vector<1x1x128xf32> to vector<1x128xf32>
    %cst_77 = arith.constant dense<0.000000e+00> : vector<16xf32>
    %180 = vector.multi_reduction <add>, %175, %cst_77 [1] : vector<16x128xf32> to vector<16xf32>
    %181 = vector.shape_cast %180 : vector<16xf32> to vector<16x1xf32>
    %cst_78 = arith.constant 1.280000e+02 : f32
    %182 = vector.broadcast %cst_78 : f32 to vector<16x1xf32>
    %183 = arith.divf %181, %182 : vector<16x1xf32>
    %184 = vector.broadcast %183 : vector<16x1xf32> to vector<16x128xf32>
    %185 = arith.subf %175, %184 : vector<16x128xf32>
    %186 = arith.mulf %185, %185 : vector<16x128xf32>
    %cst_79 = arith.constant dense<0.000000e+00> : vector<16xf32>
    %187 = vector.multi_reduction <add>, %186, %cst_79 [1] : vector<16x128xf32> to vector<16xf32>
    %188 = vector.shape_cast %187 : vector<16xf32> to vector<16x1xf32>
    %cst_80 = arith.constant 1.280000e+02 : f32
    %189 = vector.broadcast %cst_80 : f32 to vector<16x1xf32>
    %190 = arith.divf %188, %189 : vector<16x1xf32>
    %191 = vector.broadcast %183 : vector<16x1xf32> to vector<16x128xf32>
    %192 = arith.subf %175, %191 : vector<16x128xf32>
    %cst_81 = arith.constant 9.99999996E-13 : f32
    %193 = vector.broadcast %cst_81 : f32 to vector<16x1xf32>
    %194 = arith.addf %190, %193 : vector<16x1xf32>
    %195 = math.rsqrt %194 : vector<16x1xf32>
    %196 = vector.broadcast %195 : vector<16x1xf32> to vector<16x128xf32>
    %197 = arith.mulf %192, %196 : vector<16x128xf32>
    %198 = vector.broadcast %177 : vector<1x128xf32> to vector<16x128xf32>
    %199 = arith.mulf %197, %198 : vector<16x128xf32>
    %200 = vector.broadcast %179 : vector<1x128xf32> to vector<16x128xf32>
    %201 = arith.addf %199, %200 : vector<16x128xf32>
    %c0_82 = arith.constant 0 : index
    %c0_83 = arith.constant 0 : index
    %202 = vector.load %arg20[%c0_82, %c0_83] : memref<16x128xf32, #tpu.memory_space<vmem>>, vector<16x128xf32>
    tpu.vector_store %arg20[%c0_82, %c0_83], %201 {strides = array<i32>} : memref<16x128xf32, #tpu.memory_space<vmem>>, vector<16x128xf32>,
    %c1_i32 = arith.constant 1 : i32
    %203 = arith.cmpi eq, %arg0, %c1_i32 : i32
    %204 = arith.extui %203 : i1 to i32
    %c0_i32_84 = arith.constant 0 : i32
    %205 = arith.cmpi ne, %204, %c0_i32_84 : i32
    scf.if %205 {
      %c0_85 = arith.constant 0 : index
      %c0_86 = arith.constant 0 : index
      %206 = vector.load %arg20[%c0_85, %c0_86] : memref<16x128xf32, #tpu.memory_space<vmem>>, vector<1x128xf32>
      %c8 = arith.constant 8 : index
      %c0_87 = arith.constant 0 : index
      %207 = vector.load %arg20[%c8, %c0_87] : memref<16x128xf32, #tpu.memory_space<vmem>>, vector<1x128xf32>
      %208 = tpu.concatenate %206, %207 in 0 : vector<1x128xf32>, vector<1x128xf32> -> vector<2x128xf32>
      %209 = arith.truncf %208 : vector<2x128xf32> to vector<2x128xbf16>
      %c0_88 = arith.constant 0 : index
      %c0_89 = arith.constant 0 : index
      %210 = vector.load %arg17[%c0_88, %c0_89] : memref<128x128xbf16, #tpu.memory_space<vmem>>, vector<128x128xbf16>
      %cst_90 = arith.constant dense<0.000000e+00> : vector<2x128xf32>
      %211 = tpu.matmul %209, %210, %cst_90 {dimension_numbers = #tpu.dot_dimension_numbers<[1], [0], [0], [1], [0, 0, 1, 1], [], []>} : vector<2x128xbf16>, vector<128x128xbf16>, vector<2x128xf32> -> vector<2x128xf32>
      %c0_91 = arith.constant 0 : index
      %c0_92 = arith.constant 0 : index
      %212 = vector.load %arg18[%c0_91, %c0_92] : memref<1x128xf32, #tpu.memory_space<vmem>>, vector<1x128xf32>
      %213 = vector.broadcast %212 : vector<1x128xf32> to vector<2x128xf32>
      %214 = arith.addf %211, %213 : vector<2x128xf32>
      %215 = math.tanh %214 : vector<2x128xf32>
      %c0_93 = arith.constant 0 : index
      %c0_94 = arith.constant 0 : index
      %216 = vector.load %arg19[%c0_93, %c0_94] : memref<2x128xf32, #tpu.memory_space<vmem>>, vector<2x128xf32>
      tpu.vector_store %arg19[%c0_93, %c0_94], %215 {strides = array<i32>} : memref<2x128xf32, #tpu.memory_space<vmem>>, vector<2x128xf32>,
    } else {
    }
    return
  }
  func.func @transform_0(%arg0: i32) -> (i32, i32) {
    %c0_i32 = arith.constant 0 : i32
    %c0_i32_0 = arith.constant 0 : i32
    %c0_i32_1 = arith.constant 0 : i32
    return %c0_i32, %c0_i32_0 : i32, i32
  }
  func.func @transform_1(%arg0: i32) -> (i32, i32) {
    %c0_i32 = arith.constant 0 : i32
    %c0_i32_0 = arith.constant 0 : i32
    %c0_i32_1 = arith.constant 0 : i32
    return %c0_i32, %c0_i32_0 : i32, i32
  }
  func.func @transform_2(%arg0: i32) -> (i32, i32) {
    %c0_i32 = arith.constant 0 : i32
    %c0_i32_0 = arith.constant 0 : i32
    %c0_i32_1 = arith.constant 0 : i32
    return %c0_i32, %c0_i32_0 : i32, i32
  }
  func.func @transform_3(%arg0: i32) -> (i32, i32) {
    %c0_i32 = arith.constant 0 : i32
    %c0_i32_0 = arith.constant 0 : i32
    %c0_i32_1 = arith.constant 0 : i32
    return %c0_i32, %c0_i32_0 : i32, i32
  }
  func.func @transform_4(%arg0: i32) -> (i32, i32, i32) {
    %c0_i32 = arith.constant 0 : i32
    %c0_i32_0 = arith.constant 0 : i32
    %c0_i32_1 = arith.constant 0 : i32
    return %arg0, %c0_i32, %c0_i32_0 : i32, i32, i32
  }
  func.func @transform_5(%arg0: i32) -> (i32, i32, i32) {
    %c0_i32 = arith.constant 0 : i32
    %c0_i32_0 = arith.constant 0 : i32
    %c0_i32_1 = arith.constant 0 : i32
    return %arg0, %c0_i32, %c0_i32_0 : i32, i32, i32
  }
  func.func @transform_6(%arg0: i32) -> (i32, i32, i32) {
    %c0_i32 = arith.constant 0 : i32
    %c0_i32_0 = arith.constant 0 : i32
    %c0_i32_1 = arith.constant 0 : i32
    return %arg0, %c0_i32, %c0_i32_0 : i32, i32, i32
  }
  func.func @transform_7(%arg0: i32) -> (i32, i32, i32) {
    %c0_i32 = arith.constant 0 : i32
    %c0_i32_0 = arith.constant 0 : i32
    %c0_i32_1 = arith.constant 0 : i32
    return %arg0, %c0_i32, %c0_i32_0 : i32, i32, i32
  }
  func.func @transform_8(%arg0: i32) -> (i32, i32, i32) {
    %c0_i32 = arith.constant 0 : i32
    %c0_i32_0 = arith.constant 0 : i32
    %c0_i32_1 = arith.constant 0 : i32
    return %arg0, %c0_i32, %c0_i32_0 : i32, i32, i32
  }
  func.func @transform_9(%arg0: i32) -> (i32, i32, i32) {
    %c0_i32 = arith.constant 0 : i32
    %c0_i32_0 = arith.constant 0 : i32
    %c0_i32_1 = arith.constant 0 : i32
    return %arg0, %c0_i32, %c0_i32_0 : i32, i32, i32
  }
  func.func @transform_10(%arg0: i32) -> (i32, i32, i32) {
    %c0_i32 = arith.constant 0 : i32
    %c0_i32_0 = arith.constant 0 : i32
    %c0_i32_1 = arith.constant 0 : i32
    return %arg0, %c0_i32, %c0_i32_0 : i32, i32, i32
  }
  func.func @transform_11(%arg0: i32) -> (i32, i32, i32) {
    %c0_i32 = arith.constant 0 : i32
    %c0_i32_0 = arith.constant 0 : i32
    %c0_i32_1 = arith.constant 0 : i32
    return %arg0, %c0_i32, %c0_i32_0 : i32, i32, i32
  }
  func.func @transform_12(%arg0: i32) -> (i32, i32, i32) {
    %c0_i32 = arith.constant 0 : i32
    %c0_i32_0 = arith.constant 0 : i32
    %c0_i32_1 = arith.constant 0 : i32
    return %arg0, %c0_i32, %c0_i32_0 : i32, i32, i32
  }
  func.func @transform_13(%arg0: i32) -> (i32, i32, i32) {
    %c0_i32 = arith.constant 0 : i32
    %c0_i32_0 = arith.constant 0 : i32
    %c0_i32_1 = arith.constant 0 : i32
    return %arg0, %c0_i32, %c0_i32_0 : i32, i32, i32
  }
  func.func @transform_14(%arg0: i32) -> (i32, i32, i32) {
    %c0_i32 = arith.constant 0 : i32
    %c0_i32_0 = arith.constant 0 : i32
    %c0_i32_1 = arith.constant 0 : i32
    return %arg0, %c0_i32, %c0_i32_0 : i32, i32, i32
  }
  func.func @transform_15(%arg0: i32) -> (i32, i32, i32) {
    %c0_i32 = arith.constant 0 : i32
    %c0_i32_0 = arith.constant 0 : i32
    %c0_i32_1 = arith.constant 0 : i32
    return %arg0, %c0_i32, %c0_i32_0 : i32, i32, i32
  }
  func.func @transform_16(%arg0: i32) -> (i32, i32) {
    %c0_i32 = arith.constant 0 : i32
    %c0_i32_0 = arith.constant 0 : i32
    %c0_i32_1 = arith.constant 0 : i32
    return %c0_i32, %c0_i32_0 : i32, i32
  }
  func.func @transform_17(%arg0: i32) -> (i32, i32) {
    %c0_i32 = arith.constant 0 : i32
    %c0_i32_0 = arith.constant 0 : i32
    %c0_i32_1 = arith.constant 0 : i32
    return %c0_i32, %c0_i32_0 : i32, i32
  }
  func.func @transform_18(%arg0: i32) -> (i32, i32) {
    %c0_i32 = arith.constant 0 : i32
    %c0_i32_0 = arith.constant 0 : i32
    %c0_i32_1 = arith.constant 0 : i32
    return %c0_i32, %c0_i32_0 : i32, i32
  }
}

</mosaic_0001>

<bundles_post_ra>
// kernel: transformer_encoder_forward.1
= control target key start
LH: loop header
LB: loop body
LE: loop exit
PB: predicated region body
PF: predicated region fallthrough
CT: control target
= control target key end

     0   :  { %s4607_s0 = inlined_call_operand.vmem [shape: f32[16,128], index: 0, kind: input, shape index: {}]   ;;  %s4608_s1 = inlined_call_operand.vmem [shape: f32[16,16], index: 1, kind: input, shape index: {}]   ;;  %s4609_s2 = inlined_call_operand.hbm [shape: f32[1,128], index: 2, kind: input, shape index: {}]   ;;  %s4610_s3 = inlined_call_operand.hbm [shape: f32[1,128], index: 3, kind: input, shape index: {}]   ;;  %s4611_s4 = inlined_call_operand.vmem [shape: bf16[2,128,384], index: 4, kind: input, shape index: {}]   ;;  %s4612_s5 = inlined_call_operand.vmem [shape: f32[2,1,384], index: 5, kind: input, shape index: {}]   ;;  %s4613_s6 = inlined_call_operand.hbm [shape: bf16[2,128,128], index: 6, kind: input, shape index: {}]   ;;  %s4614_s7 = inlined_call_operand.vmem [shape: f32[2,1,128], index: 7, kind: input, shape index: {}]   ;;  %s4615_s8 = inlined_call_operand.hbm [shape: f32[2,1,128], index: 8, kind: input, shape index: {}]   ;;  %s4616_s9 = inlined_call_operand.hbm [shape: f32[2,1,128], index: 9, kind: input, shape index: {}]   ;;  %s4617_s10 = inlined_call_operand.hbm [shape: bf16[2,128,256], index: 10, kind: input, shape index: {}]   ;;  %s4618_s11 = inlined_call_operand.vmem [shape: f32[2,1,256], index: 11, kind: input, shape index: {}]   ;;  %s4619_s12 = inlined_call_operand.hbm [shape: bf16[2,256,128], index: 12, kind: input, shape index: {}]   ;;  %s4620_s13 = inlined_call_operand.hbm [shape: f32[2,1,128], index: 13, kind: input, shape index: {}]   ;;  %s4621_s14 = inlined_call_operand.hbm [shape: f32[2,1,128], index: 14, kind: input, shape index: {}]   ;;  %s4622_s15 = inlined_call_operand.hbm [shape: f32[2,1,128], index: 15, kind: input, shape index: {}]   ;;  %s4623_s16 = inlined_call_operand.hbm [shape: bf16[128,128], index: 16, kind: input, shape index: {}]   ;;  %s4624_s17 = inlined_call_operand.hbm [shape: f32[1,128], index: 17, kind: input, shape index: {}]   ;;  %s4625_s18 = inlined_call_operand.hbm [shape: f32[2,128], index: 18, kind: output, shape index: {}]  }
   0x1   :  { %4656 = sst [smem:[#allocation33_spill]] %s4607_s0 }
   0x2   :  { %4657 = sst [smem:[#allocation34_spill]] %s4608_s1 }
   0x3   :  { %4658 = sst [smem:[#allocation35_spill]] %s4609_s2 }
   0x4   :  { %4659 = sst [smem:[#allocation36_spill]] %s4610_s3 }
   0x5   :  { %4660 = sst [smem:[#allocation37_spill]] %s4611_s4 }
   0x6   :  { %4661 = sst [smem:[#allocation38_spill]] %s4612_s5 }
   0x7   :  { %4662 = sst [smem:[#allocation39_spill]] %s4613_s6 }
   0x8   :  { %4663 = sst [smem:[#allocation40_spill]] %s4614_s7 }
   0x9   :  { %4664 = sst [smem:[#allocation41_spill]] %s4615_s8 }
   0xa   :  { %4665 = sst [smem:[#allocation42_spill]] %s4616_s9 }
   0xb   :  { %4666 = sst [smem:[#allocation43_spill]] %s4617_s10 }
   0xc   :  { %4667 = sst [smem:[#allocation44_spill]] %s4618_s11 }
   0xd   :  { %4668 = sst [smem:[#allocation45_spill]] %s4625_s18 }
   0xe   :  { %23 = vsyncpa [#allocation5], 0 }
   0xf   :  { %24 = vsyncpa [#allocation8], 0 }
  0x10   :  { %25 = vsyncpa [#allocation19], 0 }
  0x11   :  { %26 = vsyncpa [#allocation6], 0  ;;  %s3873_s27 = smov 0   ;;  %s3875_s28 = smov 0  }
  0x12   :  { %s3877_s29 = smov 0   ;;  %s3879_s30 = smov 0  }
  0x13 LB: > { %4669 = sst [smem:[#allocation27_spill]] %s3743_s28  ;;  %s3892_s0 = sadd.s32 4294967295, %s3751_s30   ;;  %s3751_s30 = sphi %s3879_s30, %s4730_s30   ;;  %s3747_s29 = sphi %s3877_s29, %s4733_s29   ;;  %s3743_s28 = sphi %s3875_s28, %s4732_s28   ;;  %s3739_s27 = sphi %s3873_s27, %s4731_s27  }
  0x14   : > { %4670 = sst [smem:[#allocation28_spill]] %s3747_s29  ;;  %s3895_s19 = sadd.s32 1, %s3751_s30  }
  0x15   : > { %4671 = sst [smem:[#allocation29_spill]] %s3892_s0  ;;  %s172_s1 = ssub.s32 %s3751_s30, %s3895_s19 }
  0x16   : > { %4672 = sst [smem:[#allocation30_spill]] %s3895_s19  ;;  %s175_s20 = sadd.s32 1, %s3747_s29 }
  0x17   : > { %p173_p0 = scmp.eq.s32.totalorder %s172_s1, 0  ;;  %p182_p1 = scmp.ne.s32.totalorder %s3747_s29, %s3743_s28 }
  0x18   : > { %p183_p2 = scmp.eq.s32.totalorder %s3751_s30, 0  ;;  %p188_p3 = scmp.ne.s32.totalorder %s3743_s28, %s3739_s27 }
  0x19   : > { %s3905_s21 = scalar_select %p173_p0, %s3747_s29, %s175_s20  }
  0x1a   : > { %p3907_p4 = por %p183_p2, %p182_p1  ;;  %p4632_p5 = scmp.eq.s32.totalorder %s3892_s0, 0 }
  0x1b   : > { %4673 = sst [smem:[#allocation31_spill]] %s3905_s21  ;;  %p2740_p6 = scmp.ge.s32.totalorder %s3751_s30, 1 }
  0x1c   : > { %p496_p7 = scmp.lt.s32.totalorder %s3751_s30, 3  ;;  %p3916_p8 = por %p4632_p5, %p188_p3 }
  0x1d   : > { %s3753_s24 = smov [#allocation4]   ;;  %p3121_p12 = scmp.lt.s32.totalorder %s3751_s30, 2 }
  0x1e   : > { %s4675_s2 = scalar_select %p3916_p8, 1, 0 }
  0x1f   : > { %p3921_p10 = pnand %p2740_p6, %p496_p7  ;;  %s515_s25 = sshll.u32 %s3753_s24, 4  ;;  %s516_s25 = int_to_ptr.vmem [resolvable:$true] %s515_s25 }
  0x20   : > { %4676 = sst [smem:[#allocation32_spill]] %s4675_s2  ;;  %p3936_p0 = pnand %p3121_p12, %p3907_p4 }
  0x21   : > { %s4677_s23 = scalar_select %p3921_p10, 1, 0 }
  0x22   : > { %p3079_p11 = pneg %p3921_p10  ;;  %s576_s1 = sand.u32 1, %s3751_s30  }
  0x23   : > { %s4679_s27 = scalar_select %p3936_p0, 1, 0 }
  0x24   : > { %p3930_p13 = pnand %p3079_p11, %p4632_p5  ;;  %s4680_s19 = sld [smem:[#allocation35_spill]] }
  0x26   : > { %s4678_s26 = scalar_select %p3930_p13, 1, 0 }
  0x27   : > { %p3949_p2 = pneg %p3930_p13 }
  0x29   : > { %s4681_s11 = scalar_select %p3949_p2, 1, 0 }
  0x2a   : > { %s3319_s24 = scalar_lea.hbm %s4680_s19, 16 }
  0x2b   : > { %p3320_p1 = scmp.ne.s32.totalorder %s4680_s19, %s3319_s24  ;;  %p3326_p6 = scmp.lt.u32.totalorder %s3319_s24, %s4680_s19 }
  0x2d   : > { %p3322_p3 = pnand %p3949_p2, %p3320_p1 }
  0x2f   : > { %p3323_p4 = pneg %p3322_p3 }
  0x31   : > { %p3328_p7 = pnand %p3326_p6, %p3323_p4 }
  0x33   : > { %3331 = shalt.err (!%p3328_p7)
}
  0x34   : > { %s3332_s21 = scalar_lea.vmem %s516_s25, 16  ;;  %s3339_s5 = scalar_lea.vmem %s516_s25, 32 }
  0x35   : > { %p3333_p11 = scmp.ne.s32.totalorder %s516_s25, %s3332_s21  ;;  %p3340_p5 = scmp.lt.s32.totalorder %s516_s25, %s516_s25 }
  0x36   : > { %p3341_p8 = scmp.lt.s32.totalorder %s3339_s5, %s3332_s21 }
  0x37   : > { %p3335_p12 = pnand %p3333_p11, %p3949_p2 }
  0x38   : > { %p3342_p10 = por %p3341_p8, %p3340_p5 }
  0x39   : > { %p3336_p9 = pneg %p3335_p12 }
  0x3b   : > { %p3343_p0 = pnand %p3342_p10, %p3336_p9 }
  0x3d   : > { %3346 = shalt.err (!%p3343_p0)
}
  0x3e   : > { %3082 = dma.hbm_to_vmem [thread:$0]  (!%p3930_p13), %s4680_s19, 16, %s516_s25, [#allocation5]  }
  0x3f   : > { %s3966_s4 = sand.u32 1, %s3747_s29   ;;  %s2865_s22 = sshll.u32 %s3751_s30, 10 }
  0x40   : > { %s2746_s24 = sshll.u32 %s3966_s4, 6  ;;  %s4682_s6 = sld [smem:[#allocation39_spill]] }
  0x41   : > { %s580_s18 = scalar_lea.vmem [#allocation9], %s2746_s24  ;;  %s3978_s2 = sshll.u32 %s3751_s30, 4 }
  0x42   : > { %s587_s20 = sshll.u32 %s580_s18, 4  ;;  %s3980_s25 = scalar_lea.sflag [#allocation5], %s576_s1  ;;  %s3975_s20 = int_to_ptr.vmem [resolvable:$true] %s587_s20 }
  0x43   : > { %p4683_p8 = scmp.ne.s32.totalorder %s4679_s27, 0 }
  0x45   : > { %p3986_p9 = pneg %p4683_p8 }
  0x46   : > { %s3973_s5 = scalar_lea.hbm %s4682_s6, %s2865_s22  ;;  %s3352_s22 = scalar_lea.hbm %s4682_s6, 2048 }
  0x47   : > { %s3347_s19 = scalar_lea.hbm %s3973_s5, 1024  ;;  %p3353_p1 = scmp.lt.u32.totalorder %s3973_s5, %s4682_s6 }
  0x48   : > { %p3348_p5 = scmp.ne.s32.totalorder %s3973_s5, %s3347_s19  ;;  %p3354_p3 = scmp.lt.u32.totalorder %s3352_s22, %s3347_s19 }
  0x49   : > { %s4684_s29 = scalar_select %p3986_p9, 1, 0 }
  0x4a   : > { %p3350_p10 = pnand %p3986_p9, %p3348_p5  ;;  %p3355_p4 = por %p3354_p3, %p3353_p1 }
  0x4b   : > { %p3356_p6 = scmp.lt.u32.totalorder %s3347_s19, %s3973_s5 }
  0x4c   : > { %p3351_p0 = pneg %p3350_p10 }
  0x4d   : > { %p3357_p7 = por %p3356_p6, %p3355_p4 }
  0x4f   : > { %p3358_p11 = pnand %p3357_p7, %p3351_p0 }
  0x51   : > { %3361 = shalt.err (!%p3358_p11)
}
  0x52   : > { %s3362_s1 = scalar_lea.vmem %s3975_s20, 1024  ;;  %s3754_s7 = smov [#allocation9]  }
  0x53   : > { %p3363_p12 = scmp.ne.s32.totalorder %s3975_s20, %s3362_s1  ;;  %s3367_s24 = sshll.u32 %s3754_s7, 4  ;;  %s3368_s24 = int_to_ptr.vmem [resolvable:$false] %s3367_s24 }
  0x54   : > { %s3369_s21 = scalar_lea.vmem %s3368_s24, 2048  ;;  %p3370_p13 = scmp.lt.s32.totalorder %s3975_s20, %s3368_s24 }
  0x55   : > { %p3365_p5 = pnand %p3363_p12, %p3986_p9  ;;  %p3371_p2 = scmp.lt.s32.totalorder %s3369_s21, %s3362_s1 }
  0x57   : > { %p3366_p10 = pneg %p3365_p5  ;;  %p3372_p1 = por %p3371_p2, %p3370_p13 }
  0x59   : > { %p3373_p3 = pnand %p3372_p1, %p3366_p10 }
  0x5b   : > { %3376 = shalt.err (!%p3373_p3)
}
  0x5c   : > { %s4648_s19 = smov 64   ;;  %s4651_s22 = smov 4  }
  0x5d   : > { %3095 = dma.hbm_to_vmem [thread:$0]  (!%p4683_p8), %s3973_s5, 1024, %s3975_s20, %s3980_s25, %s4648_s19, %s4648_s19, %s4651_s22  }
  0x5e   : > { %s4685_s8 = sld [smem:[#allocation41_spill]]  ;;  %s606_s24 = scalar_lea.vmem [#allocation10], %s3966_s4 }
  0x5f   : > { %s613_s21 = sshll.u32 %s606_s24, 4  ;;  %s614_s21 = int_to_ptr.vmem [resolvable:$true] %s613_s21 }
  0x64   : > { %s4017_s1 = scalar_lea.hbm %s4685_s8, %s3978_s2  ;;  %s3382_s5 = scalar_lea.hbm %s4685_s8, 32 }
  0x65   : > { %s3377_s6 = scalar_lea.hbm %s4017_s1, 16  ;;  %p3383_p4 = scmp.lt.u32.totalorder %s4017_s1, %s4685_s8 }
  0x66   : > { %p3378_p13 = scmp.ne.s32.totalorder %s4017_s1, %s3377_s6  ;;  %p3384_p6 = scmp.lt.u32.totalorder %s3382_s5, %s3377_s6 }
  0x67   : > { %p3386_p11 = scmp.lt.u32.totalorder %s3377_s6, %s4017_s1 }
  0x68   : > { %p3380_p2 = pnand %p3378_p13, %p3986_p9  ;;  %p3385_p7 = por %p3384_p6, %p3383_p4 }
  0x6a   : > { %p3381_p0 = pneg %p3380_p2  ;;  %p3387_p12 = por %p3386_p11, %p3385_p7 }
  0x6c   : > { %p3388_p5 = pnand %p3387_p12, %p3381_p0 }
  0x6e   : > { %3391 = shalt.err (!%p3388_p5)
}
  0x6f   : > { %s3392_s7 = scalar_lea.vmem %s614_s21, 16  ;;  %s3757_s24 = smov [#allocation10]  }
  0x70   : > { %p3393_p10 = scmp.ne.s32.totalorder %s614_s21, %s3392_s7  ;;  %s3397_s19 = sshll.u32 %s3757_s24, 4  ;;  %s3398_s19 = int_to_ptr.vmem [resolvable:$false] %s3397_s19 }
  0x71   : > { %s3399_s28 = scalar_lea.vmem %s3398_s19, 32  ;;  %p3400_p13 = scmp.lt.s32.totalorder %s614_s21, %s3398_s19 }
  0x72   : > { %p3395_p1 = pnand %p3393_p10, %p3986_p9  ;;  %p3401_p2 = scmp.lt.s32.totalorder %s3399_s28, %s3392_s7 }
  0x74   : > { %p3396_p3 = pneg %p3395_p1  ;;  %p3402_p8 = por %p3401_p2, %p3400_p13 }
  0x76   : > { %p3403_p4 = pnand %p3402_p8, %p3396_p3 }
  0x78   : > { %3406 = shalt.err (!%p3403_p4)
}
  0x79   : > { %p4686_p6 = scmp.ne.s32.totalorder %s4679_s27, 0  ;;  %s4687_s9 = sld [smem:[#allocation42_spill]] }
  0x7a   : > { %s623_s19 = scalar_lea.vmem [#allocation11], %s3966_s4  ;;  %s2751_s18 = sshll.u32 %s3966_s4, 7 }
  0x7b   : > { %3098 = dma.hbm_to_vmem [thread:$0]  (!%p4686_p6), %s4017_s1, 16, %s614_s21, %s3980_s25  }
  0x7c   : > { %s630_s20 = sshll.u32 %s623_s19, 4  ;;  %s631_s20 = int_to_ptr.vmem [resolvable:$true] %s630_s20 }
  0x7f   : > { %s4042_s5 = scalar_lea.hbm %s4687_s9, %s3978_s2  ;;  %s3412_s21 = scalar_lea.hbm %s4687_s9, 32 }
  0x80   : > { %s3407_s7 = scalar_lea.hbm %s4042_s5, 16  ;;  %p3413_p11 = scmp.lt.u32.totalorder %s4042_s5, %s4687_s9 }
  0x81   : > { %p3408_p8 = scmp.ne.s32.totalorder %s4042_s5, %s3407_s7  ;;  %p3414_p12 = scmp.lt.u32.totalorder %s3412_s21, %s3407_s7 }
  0x82   : > { %p3416_p10 = scmp.lt.u32.totalorder %s3407_s7, %s4042_s5 }
  0x83   : > { %p3410_p0 = pnand %p3408_p8, %p3986_p9  ;;  %p3415_p5 = por %p3414_p12, %p3413_p11 }
  0x85   : > { %p3411_p7 = pneg %p3410_p0  ;;  %p3417_p1 = por %p3416_p10, %p3415_p5 }
  0x87   : > { %p3418_p3 = pnand %p3417_p1, %p3411_p7 }
  0x89   : > { %3421 = shalt.err (!%p3418_p3)
}
  0x8a   : > { %s3422_s0 = scalar_lea.vmem %s631_s20, 16  ;;  %s3758_s19 = smov [#allocation11]  }
  0x8b   : > { %p3423_p13 = scmp.ne.s32.totalorder %s631_s20, %s3422_s0  ;;  %s3427_s22 = sshll.u32 %s3758_s19, 4  ;;  %s3428_s22 = int_to_ptr.vmem [resolvable:$false] %s3427_s22 }
  0x8c   : > { %s3429_s24 = scalar_lea.vmem %s3428_s22, 32  ;;  %p3430_p8 = scmp.lt.s32.totalorder %s631_s20, %s3428_s22 }
  0x8d   : > { %p3425_p2 = pnand %p3423_p13, %p3986_p9  ;;  %p3431_p0 = scmp.lt.s32.totalorder %s3429_s24, %s3422_s0 }
  0x8f   : > { %p3426_p4 = pneg %p3425_p2  ;;  %p3432_p6 = por %p3431_p0, %p3430_p8 }
  0x91   : > { %p3433_p11 = pnand %p3432_p6, %p3426_p4 }
  0x93   : > { %3436 = shalt.err (!%p3433_p11)
}
  0x94   : > { %p4688_p12 = scmp.ne.s32.totalorder %s4679_s27, 0  ;;  %s2866_s7 = sshll.u32 %s3751_s30, 11 }
  0x95   : > { %s4689_s10 = sld [smem:[#allocation43_spill]]  ;;  %s641_s22 = scalar_lea.vmem [#allocation12], %s2751_s18 }
  0x96   : > { %3101 = dma.hbm_to_vmem [thread:$0]  (!%p4688_p12), %s4042_s5, 16, %s631_s20, %s3980_s25  }
  0x97   : > { %s648_s6 = sshll.u32 %s641_s22, 4  ;;  %s4074_s6 = int_to_ptr.vmem [resolvable:$true] %s648_s6 }
  0x9b   : > { %s4070_s28 = scalar_lea.hbm %s4689_s10, %s2866_s7  ;;  %s3442_s19 = scalar_lea.hbm %s4689_s10, 4096 }
  0x9c   : > { %s3437_s0 = scalar_lea.hbm %s4070_s28, 2048  ;;  %p3443_p10 = scmp.lt.u32.totalorder %s4070_s28, %s4689_s10 }
  0x9d   : > { %p3438_p6 = scmp.ne.s32.totalorder %s4070_s28, %s3437_s0  ;;  %p3444_p1 = scmp.lt.u32.totalorder %s3442_s19, %s3437_s0 }
  0x9e   : > { %p3446_p13 = scmp.lt.u32.totalorder %s3437_s0, %s4070_s28 }
  0x9f   : > { %p3440_p7 = pnand %p3438_p6, %p3986_p9  ;;  %p3445_p3 = por %p3444_p1, %p3443_p10 }
  0xa1   : > { %p3441_p5 = pneg %p3440_p7  ;;  %p3447_p2 = por %p3446_p13, %p3445_p3 }
  0xa3   : > { %p3448_p4 = pnand %p3447_p2, %p3441_p5 }
  0xa5   : > { %3451 = shalt.err (!%p3448_p4)
}
  0xa6   : > { %s3452_s21 = scalar_lea.vmem %s4074_s6, 2048  ;;  %s3759_s22 = smov [#allocation12]  }
  0xa7   : > { %p3453_p8 = scmp.ne.s32.totalorder %s4074_s6, %s3452_s21  ;;  %s3457_s5 = sshll.u32 %s3759_s22, 4  ;;  %s3458_s5 = int_to_ptr.vmem [resolvable:$false] %s3457_s5 }
  0xa8   : > { %s3459_s20 = scalar_lea.vmem %s3458_s5, 4096  ;;  %p3460_p6 = scmp.lt.s32.totalorder %s4074_s6, %s3458_s5 }
  0xa9   : > { %p3455_p0 = pnand %p3453_p8, %p3986_p9  ;;  %p3461_p7 = scmp.lt.s32.totalorder %s3459_s20, %s3452_s21 }
  0xab   : > { %p3456_p11 = pneg %p3455_p0  ;;  %p3462_p10 = por %p3461_p7, %p3460_p6 }
  0xad   : > { %p3463_p1 = pnand %p3462_p10, %p3456_p11 }
  0xaf   : > { %3466 = shalt.err (!%p3463_p1)
}
  0xb0   : > { %s3760_s0 = smov 128   ;;  %s3761_s19 = smov 8  }
  0xb1   : > { %3104 = dma.hbm_to_vmem [thread:$0]  (!%p4688_p12), %s4070_s28, 2048, %s4074_s6, %s3980_s25, %s3760_s0, %s3760_s0, %s3761_s19  }
  0xb2   : > { %s4103_s22 = scalar_lea.hbm %s4619_s12, %s2866_s7  ;;  %s669_s21 = scalar_lea.vmem [#allocation13], %s2751_s18 }
  0xb3   : > { %s676_s5 = sshll.u32 %s669_s21, 4  ;;  %s3467_s20 = scalar_lea.hbm %s4103_s22, 2048  ;;  %s4107_s5 = int_to_ptr.vmem [resolvable:$true] %s676_s5 }
  0xb4   : > { %p3468_p5 = scmp.ne.s32.totalorder %s4103_s22, %s3467_s20  ;;  %s3472_s6 = scalar_lea.hbm %s4619_s12, 4096 }
  0xb5   : > { %p3473_p2 = scmp.lt.u32.totalorder %s4103_s22, %s4619_s12  ;;  %p3474_p4 = scmp.lt.u32.totalorder %s3472_s6, %s3467_s20 }
  0xb6   : > { %p3470_p3 = pnand %p3468_p5, %p3986_p9  ;;  %p3476_p0 = scmp.lt.u32.totalorder %s3467_s20, %s4103_s22 }
  0xb7   : > { %p3475_p8 = por %p3474_p4, %p3473_p2 }
  0xb8   : > { %p3471_p13 = pneg %p3470_p3 }
  0xb9   : > { %p3477_p11 = por %p3476_p0, %p3475_p8 }
  0xbb   : > { %p3478_p6 = pnand %p3477_p11, %p3471_p13 }
  0xbd   : > { %3481 = shalt.err (!%p3478_p6)
}
  0xbe   : > { %s3482_s18 = scalar_lea.vmem %s4107_s5, 2048  ;;  %s3762_s19 = smov [#allocation13]  }
  0xbf   : > { %p3483_p7 = scmp.ne.s32.totalorder %s4107_s5, %s3482_s18  ;;  %s3487_s24 = sshll.u32 %s3762_s19, 4  ;;  %s3488_s24 = int_to_ptr.vmem [resolvable:$false] %s3487_s24 }
  0xc0   : > { %s3489_s1 = scalar_lea.vmem %s3488_s24, 4096  ;;  %p3490_p5 = scmp.lt.s32.totalorder %s4107_s5, %s3488_s24 }
  0xc1   : > { %p3485_p10 = pnand %p3483_p7, %p3986_p9  ;;  %p3491_p3 = scmp.lt.s32.totalorder %s3489_s1, %s3482_s18 }
  0xc3   : > { %p3486_p1 = pneg %p3485_p10  ;;  %p3492_p2 = por %p3491_p3, %p3490_p5 }
  0xc5   : > { %p3493_p4 = pnand %p3492_p2, %p3486_p1 }
  0xc7   : > { %3496 = shalt.err (!%p3493_p4)
}
  0xc8   : > { %s4690_s21 = smov 4   ;;  %s4691_s20 = smov 64  }
  0xc9   : > { %3107 = dma.hbm_to_vmem [thread:$0]  (!%p4688_p12), %s4103_s22, 2048, %s4107_s5, %s3980_s25, %s4691_s20, %s4691_s20, %s4690_s21  }
  0xca   : > { %s4138_s6 = scalar_lea.hbm %s4620_s13, %s3978_s2  ;;  %s689_s7 = scalar_lea.vmem [#allocation14], %s3966_s4 }
  0xcb   : > { %s696_s0 = sshll.u32 %s689_s7, 4  ;;  %s3497_s18 = scalar_lea.hbm %s4138_s6, 16  ;;  %s697_s0 = int_to_ptr.vmem [resolvable:$true] %s696_s0 }
  0xcc   : > { %p3498_p13 = scmp.ne.s32.totalorder %s4138_s6, %s3497_s18  ;;  %s3502_s22 = scalar_lea.hbm %s4620_s13, 32 }
  0xcd   : > { %p3503_p11 = scmp.lt.u32.totalorder %s4138_s6, %s4620_s13  ;;  %p3504_p6 = scmp.lt.u32.totalorder %s3502_s22, %s3497_s18 }
  0xce   : > { %p3500_p8 = pnand %p3498_p13, %p3986_p9  ;;  %p3506_p10 = scmp.lt.u32.totalorder %s3497_s18, %s4138_s6 }
  0xcf   : > { %p3505_p7 = por %p3504_p6, %p3503_p11 }
  0xd0   : > { %p3501_p0 = pneg %p3500_p8 }
  0xd1   : > { %p3507_p1 = por %p3506_p10, %p3505_p7 }
  0xd3   : > { %p3508_p5 = pnand %p3507_p1, %p3501_p0 }
  0xd5   : > { %3511 = shalt.err (!%p3508_p5)
}
  0xd6   : > { %s3512_s30 = scalar_lea.vmem %s697_s0, 16  ;;  %s3763_s28 = smov [#allocation14]  }
  0xd7   : > { %p3513_p3 = scmp.ne.s32.totalorder %s697_s0, %s3512_s30  ;;  %s3517_s7 = sshll.u32 %s3763_s28, 4  ;;  %s3518_s7 = int_to_ptr.vmem [resolvable:$false] %s3517_s7 }
  0xd8   : > { %s3519_s19 = scalar_lea.vmem %s3518_s7, 32  ;;  %p3520_p13 = scmp.lt.s32.totalorder %s697_s0, %s3518_s7 }
  0xd9   : > { %p3515_p2 = pnand %p3513_p3, %p3986_p9  ;;  %p3521_p8 = scmp.lt.s32.totalorder %s3519_s19, %s3512_s30 }
  0xdb   : > { %p3516_p4 = pneg %p3515_p2  ;;  %p3522_p12 = por %p3521_p8, %p3520_p13 }
  0xdd   : > { %p3523_p6 = pnand %p3522_p12, %p3516_p4 }
  0xdf   : > { %3526 = shalt.err (!%p3523_p6)
}
  0xe0   : > { %p4692_p11 = scmp.ne.s32.totalorder %s4679_s27, 0  ;;  %s3764_s18 = smov [#allocation7]  }
  0xe1   : > { %s526_s24 = sshll.u32 %s3764_s18, 4  ;;  %s4163_s1 = scalar_lea.hbm %s4621_s14, %s3978_s2  ;;  %s527_s24 = int_to_ptr.vmem [resolvable:$true] %s526_s24 }
  0xe2   : > { %3110 = dma.hbm_to_vmem [thread:$0]  (!%p4692_p11), %s4138_s6, 16, %s697_s0, %s3980_s25  }
  0xe3   : > { %s4693_s3 = sld [smem:[#allocation36_spill]]  ;;  %p4694_p0 = scmp.ne.s32.totalorder %s4681_s11, 0 }
  0xe9   : > { %s3527_s7 = scalar_lea.hbm %s4693_s3, 16 }
  0xea   : > { %p3528_p12 = scmp.ne.s32.totalorder %s4693_s3, %s3527_s7  ;;  %p3534_p1 = scmp.lt.u32.totalorder %s3527_s7, %s4693_s3 }
  0xec   : > { %p3530_p7 = pnand %p3528_p12, %p4694_p0 }
  0xee   : > { %p3531_p10 = pneg %p3530_p7 }
  0xf0   : > { %p3536_p5 = pnand %p3534_p1, %p3531_p10 }
  0xf2   : > { %3539 = shalt.err (!%p3536_p5)
}
  0xf3   : > { %s3540_s18 = scalar_lea.vmem %s527_s24, 16  ;;  %s3547_s22 = scalar_lea.vmem %s527_s24, 32 }
  0xf4   : > { %p3541_p3 = scmp.ne.s32.totalorder %s527_s24, %s3540_s18  ;;  %p3548_p13 = scmp.lt.s32.totalorder %s527_s24, %s527_s24 }
  0xf5   : > { %p3549_p8 = scmp.lt.s32.totalorder %s3547_s22, %s3540_s18 }
  0xf6   : > { %p3543_p2 = pnand %p3541_p3, %p4694_p0 }
  0xf7   : > { %p3550_p6 = por %p3549_p8, %p3548_p13 }
  0xf8   : > { %p3544_p4 = pneg %p3543_p2 }
  0xfa   : > { %p3551_p11 = pnand %p3550_p6, %p3544_p4 }
  0xfc   : > { %3554 = shalt.err (!%p3551_p11)
}
  0xfd   : > { %p4695_p12 = scmp.ne.s32.totalorder %s4678_s26, 0  ;;  %s706_s28 = scalar_lea.vmem [#allocation15], %s3966_s4 }
  0xfe   : > { %s713_s30 = sshll.u32 %s706_s28, 4  ;;  %s3765_s7 = smov [#allocation17]   ;;  %s4184_s30 = int_to_ptr.vmem [resolvable:$true] %s713_s30 }
  0xff   : > { %3085 = dma.hbm_to_vmem [thread:$0]  (!%p4695_p12), %s4693_s3, 16, %s527_s24, [#allocation8]  }
 0x100   : > { %s536_s19 = sshll.u32 %s3765_s7, 4  ;;  %s3555_s6 = scalar_lea.hbm %s4163_s1, 16  ;;  %s537_s19 = int_to_ptr.vmem [resolvable:$true] %s536_s19 }
 0x101   : > { %p3556_p11 = scmp.ne.s32.totalorder %s4163_s1, %s3555_s6  ;;  %s3560_s22 = scalar_lea.hbm %s4621_s14, 32 }
 0x102   : > { %p3561_p1 = scmp.lt.u32.totalorder %s4163_s1, %s4621_s14  ;;  %p3562_p5 = scmp.lt.u32.totalorder %s3560_s22, %s3555_s6 }
 0x103   : > { %p3558_p7 = pnand %p3556_p11, %p3986_p9  ;;  %p3564_p2 = scmp.lt.u32.totalorder %s3555_s6, %s4163_s1 }
 0x104   : > { %p3563_p3 = por %p3562_p5, %p3561_p1 }
 0x105   : > { %p3559_p10 = pneg %p3558_p7 }
 0x106   : > { %p3565_p4 = por %p3564_p2, %p3563_p3 }
 0x108   : > { %p3566_p13 = pnand %p3565_p4, %p3559_p10 }
 0x10a   : > { %3569 = shalt.err (!%p3566_p13)
}
 0x10b   : > { %s3570_s24 = scalar_lea.vmem %s4184_s30, 16  ;;  %s3766_s28 = smov [#allocation15]  }
 0x10c   : > { %p3571_p8 = scmp.ne.s32.totalorder %s4184_s30, %s3570_s24  ;;  %s3575_s7 = sshll.u32 %s3766_s28, 4  ;;  %s3576_s7 = int_to_ptr.vmem [resolvable:$false] %s3575_s7 }
 0x10d   : > { %s3577_s0 = scalar_lea.vmem %s3576_s7, 32  ;;  %p3578_p7 = scmp.lt.s32.totalorder %s4184_s30, %s3576_s7 }
 0x10e   : > { %p3573_p6 = pnand %p3571_p8, %p3986_p9  ;;  %p3579_p12 = scmp.lt.s32.totalorder %s3577_s0, %s3570_s24 }
 0x110   : > { %p3574_p11 = pneg %p3573_p6  ;;  %p3580_p1 = por %p3579_p12, %p3578_p7 }
 0x112   : > { %p3581_p5 = pnand %p3580_p1, %p3574_p11 }
 0x114   : > { %3584 = shalt.err (!%p3581_p5)
}
 0x115   : > { %p4696_p10 = scmp.ne.s32.totalorder %s4679_s27, 0  ;;  %s3585_s22 = scalar_lea.hbm %s4623_s16, 1024 }
 0x116   : > { %p3586_p3 = scmp.ne.s32.totalorder %s4623_s16, %s3585_s22  ;;  %p3592_p4 = scmp.lt.u32.totalorder %s3585_s22, %s4623_s16 }
 0x117   : > { %3113 = dma.hbm_to_vmem [thread:$0]  (!%p4696_p10), %s4163_s1, 16, %s4184_s30, %s3980_s25  }
 0x118   : > { %p3588_p12 = pnand %p3586_p3, %p4694_p0 }
 0x11a   : > { %p3589_p2 = pneg %p3588_p12 }
 0x11c   : > { %p3594_p13 = pnand %p3592_p4, %p3589_p2 }
 0x11e   : > { %3597 = shalt.err (!%p3594_p13)
}
 0x11f   : > { %s3598_s7 = scalar_lea.vmem %s537_s19, 1024  ;;  %p3606_p7 = scmp.lt.s32.totalorder %s537_s19, %s537_s19 }
 0x120   : > { %p3599_p8 = scmp.ne.s32.totalorder %s537_s19, %s3598_s7  ;;  %p3607_p1 = scmp.lt.s32.totalorder %s3598_s7, %s3598_s7 }
 0x122   : > { %p3601_p6 = pnand %p3599_p8, %p4694_p0  ;;  %p3608_p5 = por %p3607_p1, %p3606_p7 }
 0x124   : > { %p3602_p11 = pneg %p3601_p6 }
 0x126   : > { %p3609_p10 = pnand %p3608_p5, %p3602_p11 }
 0x128   : > { %3612 = shalt.err (!%p3609_p10)
}
 0x129   : > { %p4697_p3 = scmp.ne.s32.totalorder %s4678_s26, 0  ;;  %s3767_s0 = smov [#allocation18]  }
 0x12a   : > { %s550_s6 = sshll.u32 %s3767_s0, 4  ;;  %s4233_s8 = scalar_lea.hbm %s4622_s15, %s3978_s2  ;;  %s551_s6 = int_to_ptr.vmem [resolvable:$true] %s550_s6 }
 0x12b   : > { %3088 = dma.hbm_to_vmem [thread:$0]  (!%p4697_p3), %s4623_s16, 1024, %s537_s19, [#allocation8], %s4691_s20, %s4691_s20, %s4690_s21  }
 0x12c   : > { %s3613_s28 = scalar_lea.hbm %s4624_s17, 16 }
 0x12d   : > { %p3614_p10 = scmp.ne.s32.totalorder %s4624_s17, %s3613_s28  ;;  %p3620_p4 = scmp.lt.u32.totalorder %s3613_s28, %s4624_s17 }
 0x12f   : > { %p3616_p12 = pnand %p3614_p10, %p4694_p0 }
 0x131   : > { %p3617_p2 = pneg %p3616_p12 }
 0x133   : > { %p3622_p13 = pnand %p3620_p4, %p3617_p2 }
 0x135   : > { %3625 = shalt.err (!%p3622_p13)
}
 0x136   : > { %s3626_s19 = scalar_lea.vmem %s551_s6, 16  ;;  %s3633_s2 = scalar_lea.vmem %s551_s6, 32 }
 0x137   : > { %p3627_p8 = scmp.ne.s32.totalorder %s551_s6, %s3626_s19  ;;  %p3634_p7 = scmp.lt.s32.totalorder %s551_s6, %s551_s6 }
 0x138   : > { %p3635_p1 = scmp.lt.s32.totalorder %s3633_s2, %s3626_s19 }
 0x139   : > { %p3629_p6 = pnand %p3627_p8, %p4694_p0 }
 0x13a   : > { %p3636_p5 = por %p3635_p1, %p3634_p7 }
 0x13b   : > { %p3630_p11 = pneg %p3629_p6 }
 0x13d   : > { %p3637_p9 = pnand %p3636_p5, %p3630_p11 }
 0x13f   : > { %3640 = shalt.err (!%p3637_p9)
}
 0x140   : > { %3091 = dma.hbm_to_vmem [thread:$0]  (!%p4697_p3), %s4624_s17, 16, %s551_s6, [#allocation19]  }
 0x141   : > { %s723_s11 = scalar_lea.vmem [#allocation16], %s3966_s4  ;;  %s3641_s0 = scalar_lea.hbm %s4233_s8, 16 }
 0x142   : > { %s730_s30 = sshll.u32 %s723_s11, 4  ;;  %p3642_p0 = scmp.ne.s32.totalorder %s4233_s8, %s3641_s0  ;;  %s731_s30 = int_to_ptr.vmem [resolvable:$true] %s730_s30 }
 0x143   : > { %p4698_p10 = scmp.ne.s32.totalorder %s4684_s29, 0  ;;  %s3646_s22 = scalar_lea.hbm %s4622_s15, 32 }
 0x144   : > { %p3647_p2 = scmp.lt.u32.totalorder %s4233_s8, %s4622_s15  ;;  %p3648_p4 = scmp.lt.u32.totalorder %s3646_s22, %s3641_s0 }
 0x145   : > { %p3644_p12 = pnand %p3642_p0, %p4698_p10  ;;  %p3650_p8 = scmp.lt.u32.totalorder %s3641_s0, %s4233_s8 }
 0x146   : > { %p3649_p13 = por %p3648_p4, %p3647_p2 }
 0x147   : > { %p3645_p9 = pneg %p3644_p12 }
 0x148   : > { %p3651_p3 = por %p3650_p8, %p3649_p13 }
 0x14a   : > { %p3652_p6 = pnand %p3651_p3, %p3645_p9 }
 0x14c   : > { %3655 = shalt.err (!%p3652_p6)
}
 0x14d   : > { %s3656_s4 = scalar_lea.vmem %s731_s30, 16  ;;  %s3768_s6 = smov [#allocation16]  }
 0x14e   : > { %p3657_p11 = scmp.ne.s32.totalorder %s731_s30, %s3656_s4  ;;  %s3661_s28 = sshll.u32 %s3768_s6, 4  ;;  %s3662_s28 = int_to_ptr.vmem [resolvable:$false] %s3661_s28 }
 0x14f   : > { %s3663_s7 = scalar_lea.vmem %s3662_s28, 32  ;;  %p3664_p5 = scmp.lt.s32.totalorder %s731_s30, %s3662_s28 }
 0x150   : > { %p3659_p7 = pnand %p3657_p11, %p4698_p10  ;;  %p3665_p0 = scmp.lt.s32.totalorder %s3663_s7, %s3656_s4 }
 0x152   : > { %p3660_p1 = pneg %p3659_p7  ;;  %p3666_p12 = por %p3665_p0, %p3664_p5 }
 0x154   : > { %p3667_p2 = pnand %p3666_p12, %p3660_p1 }
 0x156   : > { %3670 = shalt.err (!%p3667_p2)
}
 0x157   : > { %p4699_p4 = scmp.ne.s32.totalorder %s4679_s27, 0  ;;  %p4700_p9 = scmp.ne.s32.totalorder %s4677_s23, 0 }
 0x158   : > { %s4701_s29 = sld [smem:[#allocation29_spill]] (!%p4700_p9) }
 0x159   : > { %3116 = dma.hbm_to_vmem [thread:$0]  (!%p4699_p4), %s4233_s8, 16, %s731_s30, %s3980_s25  }
 0x15a   : > { %739 = sbr.rel (%p4700_p9) target bundleno = 3996 (0xf9c), region = 92 }
 0x15e   : > { %p4702_p10 = scmp.eq.s32.totalorder (!%p4700_p9), %s4701_s29, 0 }
 0x161   : > { %3714 = dma.done.wait (%p4702_p10), [#allocation5], 16   ;;  %p4703_p13 = pmov %p4702_p10 }
 0x162   : > { %p4704_p8 = pmov %p4702_p10 }
 0x163   : > { %3716 = vsyncadd (%p4703_p13), [#allocation5], 4294967280 }
 0x164   : > { %3718 = dma.done.wait (%p4704_p8), [#allocation8], 16   ;;  %p4705_p3 = pmov %p4704_p8 }
 0x165   : > { %s4706_s27 = sld [smem:[#allocation27_spill]]  ;;  %s4707_s21 = sld [smem:[#allocation32_spill]] }
 0x166   : > { %3720 = vsyncadd (%p4705_p3), [#allocation8], 4294967280  ;;  %s749_s20 = sand.u32 1, %s4701_s29  }
 0x167   : > { %s750_s8 = scalar_lea.sflag [#allocation5], %s749_s20 }
 0x16b   : > { %s4284_s25 = sand.u32 1, %s4706_s27   ;;  %p4708_p6 = scmp.ne.s32.totalorder %s4707_s21, 0 }
 0x16c   : > { %s2763_s23 = sshll.u32 %s4284_s25, 6 }
 0x16d   : > { %s4287_s19 = scalar_lea.vmem [#allocation9], %s2763_s23 }
 0x16e   : > { %3722 = dma.done.wait (%p4708_p6), %s750_s8, 5200  }
 0x16f   : > { %3724 = vsyncadd (%p4708_p6), %s750_s8, 4294962096  ;;  %s2764_s2 = sshll.u32 %s4284_s25, 7  ;;  %p4709_p11 = pmov %p4705_p3 }
 0x170   : > { %s4296_s11 = scalar_lea.vmem [#allocation12], %s2764_s2  ;;  %s4298_s30 = scalar_lea.vmem [#allocation13], %s2764_s2 }
 0x171   : > { %3726 = dma.done.wait (%p4709_p11), [#allocation8], 1024   ;;  %p4710_p7 = pmov %p4705_p3 }
 0x172   : > { %p4711_p1 = pmov %p4705_p3 }
 0x173   : > { %3728 = vsyncadd (%p4710_p7), [#allocation8], 4294966272 }
 0x174   : > { %3730 = dma.done.wait (%p4711_p1), [#allocation19], 16   ;;  %p4712_p5 = pmov %p4711_p1 }
 0x175   : > { %p913_p0 = scmp.lt.s32.totalorder %s4701_s29, 1  ;;  %s4713_s6 = sld [smem:[#allocation40_spill]] }
 0x176   : > { %3732 = vsyncadd (%p4712_p5), [#allocation19], 4294967280  ;;  %s4714_s23 = sld [smem:[#allocation37_spill]]  ;;  %s4715_s18 = sld [smem:[#allocation44_spill]] }
 0x177   : > { %s4313_s22 = scalar_select %p913_p0, %s4701_s29, 1 }
 0x178   : > { %s4716_s9 = sld [smem:[#allocation38_spill]]  ;;  %p4717_p12 = scmp.ne.s32.totalorder %s4701_s29, 0 }
 0x179   : > { %s3041_s5 = smul.u32 192, %s4313_s22  ;;  %s2769_s27 = sshll.u32 %s4313_s22, 1  ;;  %v2771_v17 = vld [vmem:[#allocation4] ss:$0 sm:$0xff] (!%p4717_p12)  ;;  %v2772_v19 = vld [vmem:[#allocation7] ss:$0 sm:$0xff] (!%p4717_p12) }
 0x17a   : > { %s3042_s7 = smul.u32 3, %s4313_s22 }
 0x17b   : > { %s924_s28 = scalar_lea.vmem %s4713_s6, %s4313_s22  ;;  %933 = sbr.rel (%p4717_p12) target bundleno = 704 (0x2c0), region = 144 }
 0x17c   : > { %s4325_s8 = scalar_lea.vmem %s4714_s23, %s3041_s5  ;;  %s4330_s0 = scalar_lea.vmem %s4715_s18, %s2769_s27 }
 0x17d   : > { %s4718_s6 = sld [smem:[#allocation33_spill]] (!%p4717_p12) }
 0x17e   : > { %s4335_s10 = scalar_lea.vmem %s4716_s9, %s3042_s7 }
 0x183   : > { %v934_v0 = vld [vmem:[%s4718_s6] sm:$0xff]  ;;  %v935_v1 = vld [vmem:[%s4718_s6 + $0x8] sm:$0xff] }
 0x184   : > { %938 = vadd.xlane.f32.xlu0 %v934_v0 }
 0x188   : > { %940 = vadd.xlane.f32.xlu0 %v935_v1 }
 0x211   : > { %v939_v2 = vpop.xlane.xlu0 %938 }
 0x212   : > { %v943_v3 = vmul.f32 0.0078125, %v939_v2 }
 0x214   : > { %v945_v4 = vsub.f32 %v934_v0, %v943_v3 }
 0x215   : > { %v941_v5 = vpop.xlane.xlu0 %940 }
 0x216   : > { %v944_v6 = vmul.f32 0.0078125, %v941_v5  ;;  %v947_v7 = vmul.f32 %v945_v4, %v945_v4 }
 0x218   : > { %v946_v8 = vsub.f32 %v935_v1, %v944_v6  ;;  %949 = vadd.xlane.f32.xlu1 %v947_v7 }
 0x21a   : > { %v948_v9 = vmul.f32 %v946_v8, %v946_v8 }
 0x21c   : > { %951 = vadd.xlane.f32.xlu1 %v948_v9 }
 0x2a5   : > { %v950_v10 = vpop.xlane.xlu1 %949 }
 0x2a6   : > { %v953_v11 = vmul.f32 0.0078125, %v950_v10 }
 0x2a8   : > { %v955_v12 = vadd.f32 1e-12, %v953_v11 }
 0x2a9   : > { %v952_v13 = vpop.xlane.xlu1 %951 }
 0x2aa   : > { %3177 = vrsqrt.f32 %v955_v12  ;;  %v954_v14 = vmul.f32 0.0078125, %v952_v13 }
 0x2ac   : > { %v956_v15 = vadd.f32 1e-12, %v954_v14 }
 0x2ae   : > { %3179 = vrsqrt.f32 %v956_v15 }
 0x2b4   : > { %v3178_v16 = vpop.eup %3177 }
 0x2b5   : > { %v959_v18 = vmul.f32 %v3178_v16, %v945_v4 }
 0x2b7   : > { %v967_v20 = vmul.f32 %v2771_v17, %v959_v18 }
 0x2b8   : > { %v3180_v21 = vpop.eup %3179 }
 0x2b9   : > { %v975_v22 = vadd.f32 %v2772_v19, %v967_v20  ;;  %v960_v23 = vmul.f32 %v3180_v21, %v946_v8 }
 0x2bb   : > { %977 = vst [vmem:[#allocation2] sm:$0xff] %v975_v22  ;;  %v968_v24 = vmul.f32 %v2771_v17, %v960_v23 }
 0x2bd   : > { %v976_v25 = vadd.f32 %v2772_v19, %v968_v24 }
 0x2bf   : > { %978 = vst [vmem:[#allocation2 + $0x8] sm:$0xff] %v976_v25 }
 0x2c0 PF: > { %v3181_v26 = vld [vmem:[%s4325_s8 + $0x4] ss:$12 sps:$4 sm:$0xff]   ;;  %v3183_v27 = vld [vmem:[%s4325_s8] ss:$12 sps:$4 sm:$0xff]   ;;  %v3769_v28 = vmov 0   ;;  %v3770_v29 = vmov 0.0   ;;  %v1016_v55 = vlaneseq }
 0x2c1   : > { %1191 = vmatprep.mubr.bf16.mxu0 %v3769_v28  ;;  %2933 = vmatprep.subr.bf16.mxu1 %v3770_v29  ;;  %v3184_v30 = vld [vmem:[%s4325_s8 + $0x1c] ss:$12 sps:$4 sm:$0xff]   ;;  %v3186_v31 = vld [vmem:[%s4325_s8 + $0x18] ss:$12 sps:$4 sm:$0xff]   ;;  %v3187_v32 = vld [vmem:[%s4325_s8 + $0x34] ss:$12 sps:$4 sm:$0xff]  }
 0x2c2   : > { %1159 = vmatprep.subr.bf16.mxu0 %v3181_v26  ;;  %v3189_v33 = vld [vmem:[%s4325_s8 + $0x30] ss:$12 sps:$4 sm:$0xff]   ;;  %v3190_v34 = vld [vmem:[%s4325_s8 + $0x4c] ss:$12 sps:$4 sm:$0xff]   ;;  %v3192_v35 = vld [vmem:[%s4325_s8 + $0x48] ss:$12 sps:$4 sm:$0xff]  }
 0x2c3   : > { %1160 = vmatpush1.bf16.msra.mxu0 %v3183_v27  ;;  %v3193_v36 = vld [vmem:[%s4325_s8 + $0x64] ss:$12 sps:$4 sm:$0xff]   ;;  %v3205_v37 = vld [vmem:[%s4325_s8 + $0x8] ss:$12 sps:$4 sm:$0xff]   ;;  %v3206_v38 = vld [vmem:[%s4325_s8 + $0x20] ss:$12 sps:$4 sm:$0xff]  }
 0x2c4   : > { %1161 = vmatprep.subr.bf16.mxu0 %v3184_v30  ;;  %2934 = vmatpush3.bf16.msra.mxu1 %v3205_v37  ;;  %v3195_v39 = vld [vmem:[%s4325_s8 + $0x60] ss:$12 sps:$4 sm:$0xff]   ;;  %v3196_v40 = vld [vmem:[%s4325_s8 + $0x7c] ss:$12 sps:$4 sm:$0xff]   ;;  %v3198_v41 = vld [vmem:[%s4325_s8 + $0x78] ss:$12 sps:$4 sm:$0xff]  }
 0x2c5   : > { %2935 = vmatprep.subr.bf16.mxu1 %v3770_v29  ;;  %v3199_v42 = vld [vmem:[%s4325_s8 + $0x94] ss:$12 sps:$4 sm:$0xff]   ;;  %v3207_v43 = vld [vmem:[%s4325_s8 + $0x38] ss:$12 sps:$4 sm:$0xff]   ;;  %v3208_v44 = vld [vmem:[%s4325_s8 + $0x50] ss:$12 sps:$4 sm:$0xff]  }
 0x2c6   : > { %v3201_v45 = vld [vmem:[%s4325_s8 + $0x90] ss:$12 sps:$4 sm:$0xff]   ;;  %v3202_v46 = vld [vmem:[%s4325_s8 + $0xac] ss:$12 sps:$4 sm:$0xff]   ;;  %v3209_v47 = vld [vmem:[%s4325_s8 + $0x68] ss:$12 sps:$4 sm:$0xff]  }
 0x2c7   : > { %1162 = vmatpush1.bf16.msra.mxu0 %v3186_v31  ;;  %v3204_v48 = vld [vmem:[%s4325_s8 + $0xa8] ss:$12 sps:$4 sm:$0xff]   ;;  %v4371_v49 = vld [vmem:[#allocation2] sm:$0xff]  ;;  %v3212_v54 = vld [vmem:[%s4325_s8 + $0xb0] ss:$12 sps:$4 sm:$0xff]   ;;  %vm3771_vm0 = vmmov 0  }
 0x2c8   : > { %1163 = vmatprep.subr.bf16.mxu0 %v3187_v32  ;;  %2936 = vmatpush3.bf16.msra.mxu1 %v3206_v38  ;;  %v4373_v50 = vld [vmem:[#allocation2 + $0x8] sm:$0xff]  ;;  %v3211_v53 = vld [vmem:[%s4325_s8 + $0x98] ss:$12 sps:$4 sm:$0xff]   ;;  %v4392_v56 = vshrl.u32 %v1016_v55, 7  ;;  %v1014_v58 = vld [vmem:[%s4335_s10] sm:$0x7] }
 0x2c9   : > { %2937 = vmatprep.subr.bf16.mxu1 %v3770_v29  ;;  %v3210_v51 = vld [vmem:[%s4325_s8 + $0x80] ss:$12 sps:$4 sm:$0xff]   ;;  %v981_v52 = vpack.c.bf16 %v4373_v50, %v4371_v49  ;;  %2949 = vmatprep.mubr.msk.bf16.mxu1 %vm3771_vm0, %v3770_v29  ;;  %vm1248_vm1 = vcmask 261120   ;;  %s4719_s29 = sld [smem:[#allocation34_spill]]  ;;  %vm1300_vm2 = vcmask 130048   ;;  %s3772_s26 = smov 96  }
 0x2ca   : > { %v1018_v57 = vsub.s32 0, %v4392_v56  ;;  %v1022_v59 = vsub.s32 1, %v4392_v56  ;;  %v1026_v9 = vsub.s32 2, %v4392_v56  ;;  %s3773_s7 = smov 32   ;;  %s3774_s27 = smov 64   ;;  %vm1506_vm3 = vcmask 523520  }
 0x2cb   : > { %1164 = vmatpush1.bf16.msra.mxu0 %v3189_v33  ;;  %vm1642_vm4 = vcmask 785920   ;;  %vm1778_vm5 = vcmask 1048320   ;;  %s4722_s22 = scalar_lea.vmem [#allocation10], %s4284_s25  ;;  %s4727_s8 = sld [smem:[#allocation29_spill]] }
 0x2cc   : > { %1165 = vmatprep.subr.bf16.mxu0 %v3190_v34  ;;  %2938 = vmatpush3.bf16.msra.mxu1 %v3207_v43  ;;  %v1019_v60 = vrot.slane %v1014_v58, %v1018_v57  ;;  %v1023_v62 = vrot.slane %v1014_v58, %v1022_v59  ;;  %v1027_v10 = vrot.slane %v1014_v58, %v1026_v9 }
 0x2cd   : > { %2939 = vmatprep.subr.bf16.mxu1 %v3770_v29 }
 0x2cf   : > { %1166 = vmatpush1.bf16.msra.mxu0 %v3192_v35  ;;  %s4720_s3 = smov %s4719_s29  ;;  %v4414_v19 = vld [vmem:[%s4719_s29] sm:$0xff] }
 0x2d0   : > { %1167 = vmatprep.subr.bf16.mxu0 %v3193_v36  ;;  %2940 = vmatpush3.bf16.msra.mxu1 %v3208_v44  ;;  %v4419_v23 = vld [vmem:[%s4720_s3 + $0x8] sm:$0xff] }
 0x2d1   : > { %2941 = vmatprep.subr.bf16.mxu1 %v3770_v29  ;;  %p2851_p2 = scmp.ne.s32.totalorder %s4727_s8, 1 }
 0x2d2   : > { %vm3776_vm6 = vmmov (!%p2851_p2), 0   ;;  %vm2358_vm7 = vcmask (!%p2851_p2), 1040384  }
 0x2d3   : > { %1168 = vmatpush1.bf16.msra.mxu0 %v3195_v39 }
 0x2d4   : > { %1169 = vmatprep.subr.bf16.mxu0 %v3196_v40  ;;  %2942 = vmatpush3.bf16.msra.mxu1 %v3209_v47 }
 0x2d5   : > { %2943 = vmatprep.subr.bf16.mxu1 %v3770_v29 }
 0x2d7   : > { %1170 = vmatpush1.bf16.msra.mxu0 %v3198_v41 }
 0x2d8   : > { %1171 = vmatprep.subr.bf16.mxu0 %v3199_v42  ;;  %2944 = vmatpush3.bf16.msra.mxu1 %v3210_v51 }
 0x2d9   : > { %2945 = vmatprep.subr.bf16.mxu1 %v3770_v29 }
 0x2db   : > { %1172 = vmatpush1.bf16.msra.mxu0 %v3201_v45 }
 0x2dc   : > { %1173 = vmatprep.subr.bf16.mxu0 %v3202_v46  ;;  %2946 = vmatpush3.bf16.msra.mxu1 %v3211_v53 }
 0x2dd   : > { %2947 = vmatprep.subr.bf16.mxu1 %v3770_v29 }
 0x2df   : > { %1174 = vmatpush1.bf16.msra.mxu0 %v3204_v48 }
 0x2e0   : > { %2977 = vmatprep.subr.bf16.mxu0 %v3770_v29  ;;  %2948 = vmatpush3.bf16.msra.mxu1 %v3212_v54 }
 0x2e1   : > { %2953 = vmatprep.subr.bf16.mxu1 %v3770_v29 }
 0x2e2   : > { %1192 = vmatmul.mubr.bf16.vlgmr.msra.gmra.mrb[0].mxu0 %v981_v52 }
 0x2e3   : > { %2979 = vmatprep.mubr.msk.bf16.mxu0 %vm3771_vm0, %v3770_v29  ;;  %2950 = vmatmul.mubr.bf16.vlgmr.msra.gmra.mrb[0].mxu1 %v981_v52 }
 0x2e4   : > { %2955 = vmatprep.mubr.msk.bf16.mxu1 %vm3771_vm0, %v3770_v29 }
 0x3b5   : > { %v1193_v61 = vpop.f32.mrb[0].mxu0 }
 0x3b6   : > { %v1195_v63 = vpop.f32.mrb[1].mxu0  ;;  %v1194_v1 = vadd.f32 %v1193_v61, %v1019_v60  ;;  %v1236_v11 = vpop.f32.mrb[0].mxu1 }
 0x3b7   : > { %v1197_v0 = vpop.f32.mrb[2].mxu0  ;;  %v1196_v4 = vadd.f32 %v1195_v63, %v1023_v62  ;;  %v1237_v12 = vadd.f32 %v1236_v11, %v1027_v10  ;;  %v2951_v13 = vpop.f32.mrb[1].mxu1 }
 0x3b8   : > { %v1198_v2 = vadd.f32 %v1197_v0, %v1019_v60  ;;  %v1199_v3 = vpop.f32.mrb[3].mxu0  ;;  %v1239_v14 = vpop.f32.mrb[2].mxu1 }
 0x3b9   : > { %v1200_v5 = vadd.f32 %v1199_v3, %v1023_v62  ;;  %v1240_v15 = vadd.f32 %v1239_v14, %v1027_v10  ;;  %v2952_v16 = vpop.f32.mrb[3].mxu1 }
 0x3ba   : > { %v1245_v6 = vpack.c.bf16 %v1198_v2, %v1194_v1 }
 0x3bb   : > { %v1246_v7 = vpack.c.bf16 %v1200_v5, %v1196_v4  ;;  %v4407_v17 = vpack.c.bf16 %v1240_v15, %v1237_v12 }
 0x3bd   : > { %v1253_v8 = vsel %vm1248_vm1, %v1246_v7, 0 }
 0x3be   : > { %2954 = vmatpush3.bf16.xpose.msra.mxu1 %v1253_v8 }
 0x3bf   : > { %2959 = vmatprep.subr.bf16.mxu1 %v3770_v29 }
 0x3c5   : > { %2956 = vmatmul.mubr.msk.bf16.vlgmr.msra.gmra.mrb[4].mxu1 %vm1248_vm1, %v1245_v6 }
 0x3c6   : > { %2961 = vmatprep.mubr.msk.bf16.mxu1 %vm3771_vm0, %v3770_v29  ;;  %2960 = vmatpush3.bf16.msra.mxu1 %v4407_v17 }
 0x3c7   : > { %2965 = vmatprep.subr.bf16.mxu1 %v3770_v29 }
 0x498   : > { %v1289_v18 = vpop.f32.mrb[4].mxu1 }
 0x499   : > { %v1296_v20 = vmul.f32 0.17677669, %v1289_v18  ;;  %v2957_v21 = vpop.f32.mrb[5].mxu1 }
 0x49a   : > { %v1292_v22 = vpop.f32.mrb[6].mxu1 }
 0x49b   : > { %v1297_v24 = vmul.f32 0.17677669, %v1292_v22  ;;  %v2958_v25 = vpop.f32.mrb[7].mxu1  ;;  %v1298_v26 = vadd.f32 %v1296_v20, %v4414_v19 }
 0x49d   : > { %v1301_v27 = vsel %vm1300_vm2, %v1298_v26, -inf  ;;  %v1299_v30 = vadd.f32 %v1297_v24, %v4419_v23 }
 0x49e   : > { %1302 = vmax.xlane.f32.xlu0 %v1301_v27 }
 0x49f   : > { %v1304_v31 = vsel %vm1300_vm2, %v1299_v30, -inf }
 0x4a2   : > { %1305 = vmax.xlane.f32.xlu0 %v1304_v31 }
 0x4b8   : > { %1374 = vrot.lane.b32.xlu0 %v1246_v7, %s3772_s26 }
 0x4bc   : > { %1647 = vrot.lane.b32.xlu0 %v1246_v7, %s3773_s7 }
 0x52b   : > { %v1303_v32 = vpop.xlane.xlu0 %1302 }
 0x52c   : > { %v1307_v33 = vsub.f32 %v1298_v26, %v1303_v32 }
 0x52e   : > { %v1309_v34 = vmul.f32 1.442695, %v1307_v33 }
 0x52f   : > { %v1306_v35 = vpop.xlane.xlu0 %1305 }
 0x530   : > { %3261 = vpow2.f32 %v1309_v34  ;;  %v1308_v36 = vsub.f32 %v1299_v30, %v1306_v35 }
 0x532   : > { %v1311_v37 = vmul.f32 1.442695, %v1308_v36 }
 0x533   : > { %v1375_v45 = vpop.permute.xlu0 %1374 }
 0x534   : > { %3263 = vpow2.f32 %v1311_v37  ;;  %v1380_v58 = vsel %vm1248_vm1, %v1375_v45, 0 }
 0x537   : > { %v1648_v54 = vpop.permute.xlu0 %1647 }
 0x538   : > { %v1653_v61 = vsel %vm1248_vm1, %v1648_v54, 0 }
 0x53a   : > { %v3262_v38 = vpop.eup %3261 }
 0x53b   : > { %v1313_v39 = vsel %vm1300_vm2, %v3262_v38, 0.0 }
 0x53c   : > { %1314 = vadd.xlane.f32.xlu1 %v1313_v39 }
 0x53e   : > { %v3264_v40 = vpop.eup %3263 }
 0x53f   : > { %v1316_v41 = vsel %vm1300_vm2, %v3264_v40, 0.0 }
 0x540   : > { %1317 = vadd.xlane.f32.xlu1 %v1316_v41 }
 0x551   : > { %1371 = vrot.lane.b32.xlu1 %v1245_v6, %s3772_s26 }
 0x555   : > { %1511 = vrot.lane.b32.xlu1 %v1246_v7, %s3774_s27 }
 0x559   : > { %1509 = vrot.lane.b32.xlu1 %v1245_v6, %s3774_s27 }
 0x55d   : > { %1645 = vrot.lane.b32.xlu1 %v1245_v6, %s3773_s7 }
 0x5c9   : > { %v1315_v42 = vpop.xlane.xlu1 %1314 }
 0x5ca   : > { %3265 = vrcp.f32 %v1315_v42 }
 0x5cd   : > { %v1318_v43 = vpop.xlane.xlu1 %1317 }
 0x5ce   : > { %3267 = vrcp.f32 %v1318_v43 }
 0x5d1   : > { %v1372_v44 = vpop.permute.xlu1 %1371 }
 0x5d4   : > { %v3266_v47 = vpop.eup %3265 }
 0x5d5   : > { %v1512_v46 = vpop.permute.xlu1 %1511  ;;  %v1321_v52 = vmul.f32 %v3266_v47, %v3262_v38 }
 0x5d6   : > { %v1517_v48 = vsel %vm1248_vm1, %v1512_v46, 0 }
 0x5d7   : > { %2978 = vmatpush3.bf16.xpose.msra.mxu0 %v1517_v48 }
 0x5d8   : > { %v3268_v51 = vpop.eup %3267  ;;  %2989 = vmatprep.subr.bf16.mxu0 %v3770_v29 }
 0x5d9   : > { %v1322_v53 = vmul.f32 %v3268_v51, %v3264_v40  ;;  %v1510_v60 = vpop.permute.xlu1 %1509 }
 0x5db   : > { %v1323_v55 = vpack.c.bf16 %v1322_v53, %v1321_v52 }
 0x5dd   : > { %2962 = vmatmul.mubr.msk.bf16.vlgmr.msra.gmra.mrb[8].mxu1 %vm1300_vm2, %v1323_v55  ;;  %v1646_v62 = vpop.permute.xlu1 %1645 }
 0x5de   : > { %2966 = vmatpush3.bf16.xpose.msra.mxu1 %v1380_v58  ;;  %2980 = vmatmul.mubr.msk.bf16.vlgmr.msra.gmra.mrb[4].mxu0 %vm1248_vm1, %v1510_v60 }
 0x5df   : > { %2990 = vmatpush3.bf16.xpose.msra.mxu0 %v1653_v61  ;;  %2967 = vmatprep.mubr.msk.bf16.mxu1 %vm3771_vm0, %v3770_v29 }
 0x5e0   : > { %2991 = vmatprep.mubr.msk.bf16.mxu0 %vm3771_vm0, %v3770_v29  ;;  %2971 = vmatprep.subr.bf16.mxu1 %v3770_v29 }
 0x5e1   : > { %3001 = vmatprep.subr.bf16.mxu0 %v3770_v29 }
 0x5e5   : > { %2968 = vmatmul.mubr.msk.bf16.vlgmr.msra.gmra.mrb[12].mxu1 %vm1248_vm1, %v1372_v44 }
 0x5e6   : > { %2992 = vmatmul.mubr.msk.bf16.vlgmr.msra.gmra.mrb[8].mxu0 %vm1248_vm1, %v1646_v62  ;;  %2973 = vmatprep.mubr.msk.bf16.mxu1 %vm3771_vm0, %v3770_v29 }
 0x5e7   : > { %3017 = vmatprep.mubr.msk.bf16.mxu0 %vm3771_vm0, %v3770_v29 }
 0x6b0   : > { %v1361_v63 = vpop.f32.mrb[8].mxu1 }
 0x6b1   : > { %1368 = vst.msk [vmem:[#allocation3] sm:$0xff] %vm1248_vm1, %v1361_v63  ;;  %v2963_v0 = vpop.f32.mrb[9].mxu1  ;;  %v1553_v1 = vpop.f32.mrb[4].mxu0 }
 0x6b2   : > { %v1364_v2 = vpop.f32.mrb[10].mxu1  ;;  %v2981_v3 = vpop.f32.mrb[5].mxu0  ;;  %v1560_v8 = vmul.f32 0.17677669, %v1553_v1 }
 0x6b3   : > { %1369 = vst.msk [vmem:[#allocation3 + $0x8] sm:$0xff] %vm1248_vm1, %v1364_v2  ;;  %v2964_v4 = vpop.f32.mrb[11].mxu1  ;;  %v1556_v5 = vpop.f32.mrb[6].mxu0 }
 0x6b4   : > { %v2982_v6 = vpop.f32.mrb[7].mxu0  ;;  %v1561_v22 = vmul.f32 0.17677669, %v1556_v5  ;;  %v1562_v26 = vadd.f32 %v1560_v8, %v4414_v19 }
 0x6b6   : > { %v1564_v32 = vsel %vm1300_vm2, %v1562_v26, -inf  ;;  %v1563_v33 = vadd.f32 %v1561_v22, %v4419_v23 }
 0x6b8   : > { %v1416_v7 = vpop.f32.mrb[12].mxu1  ;;  %v1567_v35 = vsel %vm1300_vm2, %v1563_v33, -inf }
 0x6b9   : > { %v1423_v9 = vmul.f32 0.17677669, %v1416_v7  ;;  %v2969_v10 = vpop.f32.mrb[13].mxu1  ;;  %v1689_v11 = vpop.f32.mrb[8].mxu0 }
 0x6ba   : > { %v1419_v12 = vpop.f32.mrb[14].mxu1  ;;  %v2993_v13 = vpop.f32.mrb[9].mxu0  ;;  %v1696_v31 = vmul.f32 0.17677669, %v1689_v11 }
 0x6bb   : > { %v1424_v14 = vmul.f32 0.17677669, %v1419_v12  ;;  %v2970_v15 = vpop.f32.mrb[15].mxu1  ;;  %v1692_v16 = vpop.f32.mrb[10].mxu0  ;;  %v1425_v18 = vadd.f32 %v1423_v9, %v4414_v19 }
 0x6bc   : > { %v1697_v20 = vmul.f32 0.17677669, %v1692_v16  ;;  %v2994_v21 = vpop.f32.mrb[11].mxu0  ;;  %v1698_v36 = vadd.f32 %v1696_v31, %v4414_v19 }
 0x6bd   : > { %v1427_v24 = vsel %vm1300_vm2, %v1425_v18, -inf  ;;  %v1426_v25 = vadd.f32 %v1424_v14, %v4419_v23 }
 0x6be   : > { %1428 = vmax.xlane.f32.xlu0 %v1427_v24  ;;  %v1699_v30 = vadd.f32 %v1697_v20, %v4419_v23  ;;  %v1700_v37 = vsel %vm1300_vm2, %v1698_v36, -inf }
 0x6bf   : > { %v1430_v27 = vsel %vm1300_vm2, %v1426_v25, -inf }
 0x6c0   : > { %1431 = vmax.xlane.f32.xlu1 %v1430_v27  ;;  %v1703_v34 = vsel %vm1300_vm2, %v1699_v30, -inf }
 0x6c2   : > { %1565 = vmax.xlane.f32.xlu0 %v1564_v32 }
 0x6c4   : > { %1704 = vmax.xlane.f32.xlu1 %v1703_v34 }
 0x6c6   : > { %1568 = vmax.xlane.f32.xlu0 %v1567_v35  ;;  %v3213_v35 = vld [vmem:[%s4287_s19] sm:$0xff]  }
 0x6c7   : > { %3002 = vmatpush3.bf16.msra.mxu0 %v3213_v35  ;;  %v3242_v35 = vld [vmem:[%s4296_s11 + $0x70] ss:$8 sps:$4 sm:$0xff]  }
 0x6c8   : > { %3003 = vmatprep.subr.bf16.mxu0 %v3770_v29 }
 0x6ca   : > { %1701 = vmax.xlane.f32.xlu0 %v1700_v37  ;;  %v3215_v37 = vld [vmem:[%s4287_s19 + $0x10] sm:$0xff]  }
 0x74b   : > { %v1429_v38 = vpop.xlane.xlu0 %1428 }
 0x74c   : > { %v1433_v46 = vsub.f32 %v1425_v18, %v1429_v38  ;;  %v3216_v38 = vld [vmem:[%s4287_s19 + $0x18] sm:$0xff]  }
 0x74d   : > { %v1432_v39 = vpop.xlane.xlu1 %1431 }
 0x74e   : > { %v1434_v47 = vsub.f32 %v1426_v25, %v1432_v39  ;;  %v1435_v53 = vmul.f32 1.442695, %v1433_v46  ;;  %v3217_v39 = vld [vmem:[%s4287_s19 + $0x20] sm:$0xff]  }
 0x74f   : > { %v1566_v40 = vpop.xlane.xlu0 %1565 }
 0x750   : > { %v1570_v41 = vsub.f32 %v1562_v26, %v1566_v40  ;;  %v1437_v54 = vmul.f32 1.442695, %v1434_v47  ;;  %v3220_v47 = vld [vmem:[%s4287_s19 + $0x38] sm:$0xff]  }
 0x751   : > { %v1705_v42 = vpop.xlane.xlu1 %1704 }
 0x752   : > { %v1572_v43 = vmul.f32 1.442695, %v1570_v41  ;;  %v1707_v44 = vsub.f32 %v1699_v30, %v1705_v42 }
 0x753   : > { %v1569_v23 = vpop.xlane.xlu0 %1568 }
 0x754   : > { %3269 = vpow2.f32 %v1572_v43  ;;  %v1571_v45 = vsub.f32 %v1563_v33, %v1569_v23  ;;  %v1710_v48 = vmul.f32 1.442695, %v1707_v44  ;;  %v3218_v43 = vld [vmem:[%s4287_s19 + $0x28] sm:$0xff]   ;;  %v3219_v44 = vld [vmem:[%s4287_s19 + $0x30] sm:$0xff]  }
 0x756   : > { %v1574_v51 = vmul.f32 1.442695, %v1571_v45 }
 0x757   : > { %v1702_v52 = vpop.xlane.xlu0 %1701 }
 0x758   : > { %3271 = vpow2.f32 %v1574_v51  ;;  %v1706_v19 = vsub.f32 %v1698_v36, %v1702_v52  ;;  %v3214_v36 = vld [vmem:[%s4287_s19 + $0x8] sm:$0xff]  }
 0x759   : > { %3273 = vpow2.f32 %v1710_v48  ;;  %3004 = vmatpush3.bf16.msra.mxu0 %v3214_v36 }
 0x75a   : > { %v1708_v55 = vmul.f32 1.442695, %v1706_v19  ;;  %3005 = vmatprep.subr.bf16.mxu0 %v3770_v29 }
 0x75c   : > { %3275 = vpow2.f32 %v1708_v55 }
 0x75d   : > { %3277 = vpow2.f32 %v1435_v53  ;;  %3006 = vmatpush3.bf16.msra.mxu0 %v3215_v37 }
 0x75e   : > { %v3270_v58 = vpop.eup %3269  ;;  %3279 = vpow2.f32 %v1437_v54  ;;  %3007 = vmatprep.subr.bf16.mxu0 %v3770_v29 }
 0x75f   : > { %v1576_v60 = vsel %vm1300_vm2, %v3270_v58, 0.0 }
 0x760   : > { %1577 = vadd.xlane.f32.xlu0 %v1576_v60 }
 0x761   : > { %3008 = vmatpush3.bf16.msra.mxu0 %v3216_v38 }
 0x762   : > { %v3272_v61 = vpop.eup %3271  ;;  %3009 = vmatprep.subr.bf16.mxu0 %v3770_v29 }
 0x763   : > { %v1579_v62 = vsel %vm1300_vm2, %v3272_v61, 0.0  ;;  %v3274_v63 = vpop.eup %3273 }
 0x764   : > { %1580 = vadd.xlane.f32.xlu1 %v1579_v62  ;;  %v1715_v3 = vsel %vm1300_vm2, %v3274_v63, 0.0 }
 0x765   : > { %3010 = vmatpush3.bf16.msra.mxu0 %v3217_v39 }
 0x766   : > { %v3276_v0 = vpop.eup %3275  ;;  %3011 = vmatprep.subr.bf16.mxu0 %v3770_v29 }
 0x767   : > { %v3278_v1 = vpop.eup %3277  ;;  %v1712_v2 = vsel %vm1300_vm2, %v3276_v0, 0.0 }
 0x768   : > { %v3280_v4 = vpop.eup %3279  ;;  %1713 = vadd.xlane.f32.xlu0 %v1712_v2  ;;  %1716 = vadd.xlane.f32.xlu1 %v1715_v3  ;;  %v1439_v5 = vsel %vm1300_vm2, %v3278_v1, 0.0 }
 0x769   : > { %v1442_v6 = vsel %vm1300_vm2, %v3280_v4, 0.0  ;;  %3012 = vmatpush3.bf16.msra.mxu0 %v3218_v43  ;;  %v2814_v43 = vld [vmem:[%s4722_s22] ss:$0 sm:$0xff] }
 0x76a   : > { %3013 = vmatprep.subr.bf16.mxu0 %v3770_v29 }
 0x76c   : > { %1440 = vadd.xlane.f32.xlu0 %v1439_v5  ;;  %1443 = vadd.xlane.f32.xlu1 %v1442_v6 }
 0x76d   : > { %3014 = vmatpush3.bf16.msra.mxu0 %v3219_v44 }
 0x76e   : > { %3015 = vmatprep.subr.bf16.mxu0 %v3770_v29 }
 0x771   : > { %3016 = vmatpush3.bf16.msra.mxu0 %v3220_v47 }
 0x77d   : > { %1587 = vrot.lane.b32.xlu1 %v4407_v17, %s3774_s27 }
 0x781   : > { %1723 = vrot.lane.b32.xlu1 %v4407_v17, %s3773_s7 }
 0x782   : > { %1451 = vrot.lane.b32.xlu0 %v4407_v17, %s3772_s26 }
 0x7ed   : > { %v1578_v7 = vpop.xlane.xlu0 %1577 }
 0x7f1   : > { %v1581_v8 = vpop.xlane.xlu1 %1580 }
 0x7f5   : > { %v1714_v9 = vpop.xlane.xlu0 %1713  ;;  %v1717_v10 = vpop.xlane.xlu1 %1716 }
 0x7f9   : > { %v1441_v11 = vpop.xlane.xlu0 %1440  ;;  %v1444_v12 = vpop.xlane.xlu1 %1443 }
 0x7fa   : > { %3281 = vrcp.f32 %v1441_v11  ;;  %v3223_v11 = vld [vmem:[%s4296_s11 + $0x4] ss:$8 sps:$4 sm:$0xff]  }
 0x7fb   : > { %3283 = vrcp.f32 %v1444_v12  ;;  %v3226_v12 = vld [vmem:[%s4296_s11 + $0x14] ss:$8 sps:$4 sm:$0xff]  }
 0x7fc   : > { %3285 = vrcp.f32 %v1581_v8 }
 0x7fd   : > { %v1452_v13 = vpop.permute.xlu0 %1451  ;;  %3287 = vrcp.f32 %v1578_v7  ;;  %v1588_v21 = vpop.permute.xlu1 %1587 }
 0x7fe   : > { %2972 = vmatpush3.bf16.msra.mxu1 %v1452_v13  ;;  %3289 = vrcp.f32 %v1714_v9  ;;  %v3224_v13 = vld [vmem:[%s4296_s11 + $0x10] ss:$8 sps:$4 sm:$0xff]  }
 0x7ff   : > { %2983 = vmatprep.subr.bf16.mxu1 %v3770_v29  ;;  %3291 = vrcp.f32 %v1717_v10  ;;  %v3221_v10 = vld [vmem:[%s4296_s11] ss:$8 sps:$4 sm:$0xff]  }
 0x801   : > { %v1724_v31 = vpop.permute.xlu1 %1723 }
 0x804   : > { %v3282_v14 = vpop.eup %3281 }
 0x805   : > { %v3284_v15 = vpop.eup %3283  ;;  %v1447_v16 = vmul.f32 %v3282_v14, %v3278_v1  ;;  %v2805_v1 = vld [vmem:[%s924_s28] ss:$0 sm:$0xff]  ;;  %s4726_s28 = scalar_lea.vmem [#allocation16], %s4284_s25 }
 0x806   : > { %v1448_v18 = vmul.f32 %v3284_v15, %v3280_v4  ;;  %v3286_v20 = vpop.eup %3285 }
 0x807   : > { %v3288_v22 = vpop.eup %3287  ;;  %v1585_v24 = vmul.f32 %v3286_v20, %v3272_v61 }
 0x808   : > { %v1449_v17 = vpack.c.bf16 %v1448_v18, %v1447_v16  ;;  %v1584_v25 = vmul.f32 %v3288_v22, %v3270_v58  ;;  %v3290_v26 = vpop.eup %3289  ;;  %v3227_v22 = vld [vmem:[%s4296_s11 + $0x20] ss:$8 sps:$4 sm:$0xff]  }
 0x809   : > { %v3292_v30 = vpop.eup %3291  ;;  %v1720_v32 = vmul.f32 %v3290_v26, %v3276_v0  ;;  %v3235_v26 = vld [vmem:[%s4296_s11 + $0x44] ss:$8 sps:$4 sm:$0xff]  }
 0x80a   : > { %2974 = vmatmul.mubr.msk.bf16.vlgmr.msra.gmra.mrb[16].mxu1 %vm1300_vm2, %v1449_v17  ;;  %v1586_v27 = vpack.c.bf16 %v1585_v24, %v1584_v25  ;;  %v1721_v33 = vmul.f32 %v3292_v30, %v3274_v63  ;;  %v3232_v24 = vld [vmem:[%s4296_s11 + $0x34] ss:$8 sps:$4 sm:$0xff]   ;;  %v3230_v25 = vld [vmem:[%s4296_s11 + $0x30] ss:$8 sps:$4 sm:$0xff]  }
 0x80b   : > { %2984 = vmatpush3.bf16.msra.mxu1 %v1588_v21  ;;  %2985 = vmatprep.mubr.msk.bf16.mxu1 %vm3771_vm0, %v3770_v29  ;;  %v3229_v21 = vld [vmem:[%s4296_s11 + $0x24] ss:$8 sps:$4 sm:$0xff]   ;;  %v3238_v30 = vld [vmem:[%s4296_s11 + $0x54] ss:$8 sps:$4 sm:$0xff]  }
 0x80c   : > { %2995 = vmatprep.subr.bf16.mxu1 %v3770_v29  ;;  %v1722_v34 = vpack.c.bf16 %v1721_v33, %v1720_v32  ;;  %v3241_v32 = vld [vmem:[%s4296_s11 + $0x64] ss:$8 sps:$4 sm:$0xff]   ;;  %v3239_v33 = vld [vmem:[%s4296_s11 + $0x60] ss:$8 sps:$4 sm:$0xff]  }
 0x812   : > { %2986 = vmatmul.mubr.msk.bf16.vlgmr.msra.gmra.mrb[20].mxu1 %vm1300_vm2, %v1586_v27  ;;  %v3233_v27 = vld [vmem:[%s4296_s11 + $0x40] ss:$8 sps:$4 sm:$0xff]  }
 0x813   : > { %2996 = vmatpush3.bf16.msra.mxu1 %v1724_v31  ;;  %2997 = vmatprep.mubr.msk.bf16.mxu1 %vm3771_vm0, %v3770_v29  ;;  %v3236_v31 = vld [vmem:[%s4296_s11 + $0x50] ss:$8 sps:$4 sm:$0xff]  }
 0x814   : > { %2048 = vmatprep.subr.bf16.mxu1 %v3223_v11 }
 0x81a   : > { %2998 = vmatmul.mubr.msk.bf16.vlgmr.msra.gmra.mrb[24].mxu1 %vm1300_vm2, %v1722_v34  ;;  %v3244_v34 = vld [vmem:[%s4296_s11 + $0x74] ss:$8 sps:$4 sm:$0xff]   ;;  %s4723_s11 = scalar_lea.vmem [#allocation11], %s4284_s25 }
 0x81b   : > { %2080 = vmatprep.mubr.bf16.mxu1 %v3769_v28  ;;  %2049 = vmatpush1.bf16.msra.mxu1 %v3221_v10 }
 0x81c   : > { %2050 = vmatprep.subr.bf16.mxu1 %v3226_v12 }
 0x81f   : > { %2051 = vmatpush1.bf16.msra.mxu1 %v3224_v13 }
 0x820   : > { %2052 = vmatprep.subr.bf16.mxu1 %v3229_v21 }
 0x823   : > { %2053 = vmatpush1.bf16.msra.mxu1 %v3227_v22 }
 0x824   : > { %2054 = vmatprep.subr.bf16.mxu1 %v3232_v24 }
 0x827   : > { %2055 = vmatpush1.bf16.msra.mxu1 %v3230_v25 }
 0x828   : > { %2056 = vmatprep.subr.bf16.mxu1 %v3235_v26 }
 0x82b   : > { %2057 = vmatpush1.bf16.msra.mxu1 %v3233_v27 }
 0x82c   : > { %2058 = vmatprep.subr.bf16.mxu1 %v3238_v30 }
 0x82f   : > { %2059 = vmatpush1.bf16.msra.mxu1 %v3236_v31 }
 0x830   : > { %2060 = vmatprep.subr.bf16.mxu1 %v3241_v32 }
 0x833   : > { %2061 = vmatpush1.bf16.msra.mxu1 %v3239_v33 }
 0x834   : > { %2062 = vmatprep.subr.bf16.mxu1 %v3244_v34 }
 0x837   : > { %2063 = vmatpush1.bf16.msra.mxu1 %v3242_v35 }
 0x8dd   : > { %v1491_v28 = vpop.f32.mrb[16].mxu1 }
 0x8de   : > { %1500 = vrot.lane.b32.xlu1 %v1491_v28, %s3773_s7  ;;  %v2975_v40 = vpop.f32.mrb[17].mxu1 }
 0x8df   : > { %v1494_v41 = vpop.f32.mrb[18].mxu1 }
 0x8e0   : > { %1502 = vrot.lane.b32.xlu0 %v1494_v41, %s3773_s7  ;;  %v2976_v42 = vpop.f32.mrb[19].mxu1 }
 0x8e5   : > { %v1627_v23 = vpop.f32.mrb[20].mxu1 }
 0x8e6   : > { %1636 = vrot.lane.b32.xlu1 %v1627_v23, %s3774_s27  ;;  %v2987_v45 = vpop.f32.mrb[21].mxu1 }
 0x8e7   : > { %v1630_v46 = vpop.f32.mrb[22].mxu1 }
 0x8e8   : > { %1638 = vrot.lane.b32.xlu0 %v1630_v46, %s3774_s27  ;;  %v2988_v48 = vpop.f32.mrb[23].mxu1  ;;  %v2815_v46 = vld [vmem:[%s4723_s11] ss:$0 sm:$0xff] }
 0x8ed   : > { %v1763_v51 = vpop.f32.mrb[24].mxu1 }
 0x8ee   : > { %1772 = vrot.lane.b32.xlu1 %v1763_v51, %s3772_s26  ;;  %v2999_v52 = vpop.f32.mrb[25].mxu1 }
 0x8ef   : > { %v1766_v19 = vpop.f32.mrb[26].mxu1 }
 0x8f0   : > { %1774 = vrot.lane.b32.xlu0 %v1766_v19, %s3772_s26  ;;  %v3000_v53 = vpop.f32.mrb[27].mxu1  ;;  %v3245_v19 = vld [vmem:[%s4298_s30 + $0x40] sm:$0xff]  }
 0x8f1   : > { %v3246_v53 = vld [vmem:[%s4298_s30] sm:$0xff]   ;;  %2902 = vmatprep.subr.bf16.mxu0 %v3245_v19 }
 0x950   : > { %v1501_v54 = vpop.permute.xlu1 %1500 }
 0x951   : > { %1507 = vst.msk [vmem:[#allocation3] sm:$0xff] %vm1506_vm3, %v1501_v54  ;;  %v3247_v54 = vld [vmem:[%s4298_s30 + $0x48] sm:$0xff]  }
 0x952   : > { %v1503_v55 = vpop.permute.xlu0 %1502 }
 0x953   : > { %1508 = vst.msk [vmem:[#allocation3 + $0x8] sm:$0xff] %vm1506_vm3, %v1503_v55  ;;  %v3248_v55 = vld [vmem:[%s4298_s30 + $0x8] sm:$0xff]  }
 0x958   : > { %v1637_v58 = vpop.permute.xlu1 %1636 }
 0x959   : > { %1643 = vst.msk [vmem:[#allocation3] sm:$0xff] %vm1642_vm4, %v1637_v58  ;;  %v3249_v58 = vld [vmem:[%s4298_s30 + $0x50] sm:$0xff]  }
 0x95a   : > { %v1639_v60 = vpop.permute.xlu0 %1638 }
 0x95b   : > { %1644 = vst.msk [vmem:[#allocation3 + $0x8] sm:$0xff] %vm1642_vm4, %v1639_v60  ;;  %v3250_v60 = vld [vmem:[%s4298_s30 + $0x10] sm:$0xff]  }
 0x960   : > { %v1773_v29 = vpop.permute.xlu1 %1772 }
 0x961   : > { %1779 = vst.msk [vmem:[#allocation3] sm:$0xff] %vm1778_vm5, %v1773_v29  ;;  %v3251_v29 = vld [vmem:[%s4298_s30 + $0x58] sm:$0xff]  }
 0x962   : > { %v1775_v61 = vpop.permute.xlu0 %1774 }
 0x963   : > { %1780 = vst.msk [vmem:[#allocation3 + $0x8] sm:$0xff] %vm1778_vm5, %v1775_v61  ;;  %v3252_v61 = vld [vmem:[%s4298_s30 + $0x18] sm:$0xff]  }
 0x968   : > { %v1781_v62 = vld [vmem:[#allocation3] sm:$0xff] }
 0x96a   : > { %v1782_v63 = vld [vmem:[#allocation3 + $0x8] sm:$0xff] }
 0x96b   : > { %v1783_v0 = vpack.c.bf16 %v1782_v63, %v1781_v62  ;;  %v3253_v62 = vld [vmem:[%s4298_s30 + $0x60] sm:$0xff]  }
 0x96c   : > { %v3254_v63 = vld [vmem:[%s4298_s30 + $0x20] sm:$0xff]  }
 0x96d   : > { %3018 = vmatmul.mubr.bf16.vlgmr.msra.gmra.mrb[12].mxu0 %v1783_v0  ;;  %v3255_v0 = vld [vmem:[%s4298_s30 + $0x68] sm:$0xff]  }
 0x96e   : > { %2903 = vmatpush3.bf16.msra.mxu0 %v3246_v53 }
 0x96f   : > { %2904 = vmatprep.subr.bf16.mxu0 %v3247_v54 }
 0x972   : > { %2905 = vmatpush3.bf16.msra.mxu0 %v3248_v55 }
 0x973   : > { %2906 = vmatprep.subr.bf16.mxu0 %v3249_v58 }
 0x976   : > { %2907 = vmatpush3.bf16.msra.mxu0 %v3250_v60 }
 0x977   : > { %2908 = vmatprep.subr.bf16.mxu0 %v3251_v29 }
 0x97a   : > { %2909 = vmatpush3.bf16.msra.mxu0 %v3252_v61 }
 0x97b   : > { %2910 = vmatprep.subr.bf16.mxu0 %v3253_v62 }
 0x97e   : > { %2911 = vmatpush3.bf16.msra.mxu0 %v3254_v63 }
 0x97f   : > { %2912 = vmatprep.subr.bf16.mxu0 %v3255_v0 }
 0xa40   : > { %v1889_v2 = vpop.f32.mrb[12].mxu0 }
 0xa41   : > { %v1890_v3 = vadd.f32 %v2805_v1, %v1889_v2  ;;  %v3019_v4 = vpop.f32.mrb[13].mxu0  ;;  %v3257_v2 = vld [vmem:[%s4298_s30 + $0x70] sm:$0xff]  }
 0xa42   : > { %v1892_v5 = vpop.f32.mrb[14].mxu0  ;;  %v3259_v4 = vld [vmem:[%s4298_s30 + $0x78] sm:$0xff]  }
 0xa43   : > { %v1893_v6 = vadd.f32 %v2805_v1, %v1892_v5  ;;  %v3020_v7 = vpop.f32.mrb[15].mxu0  ;;  %v1896_v8 = vadd.f32 %v1890_v3, %v4371_v49  ;;  %v3256_v1 = vld [vmem:[%s4298_s30 + $0x28] sm:$0xff]   ;;  %v3258_v3 = vld [vmem:[%s4298_s30 + $0x30] sm:$0xff]   ;;  %v3260_v5 = vld [vmem:[%s4298_s30 + $0x38] sm:$0xff]   ;;  %s4724_s30 = scalar_lea.vmem [#allocation14], %s4284_s25 }
 0xa44   : > { %2913 = vmatpush3.bf16.msra.mxu0 %v3256_v1  ;;  %v2832_v58 = vld [vmem:[%s4724_s30] ss:$0 sm:$0xff] }
 0xa45   : > { %1900 = vadd.xlane.f32.xlu1 %v1896_v8  ;;  %v1897_v9 = vadd.f32 %v1893_v6, %v4373_v50  ;;  %2914 = vmatprep.subr.bf16.mxu0 %v3257_v2  ;;  %v1956_v6 = vld [vmem:[%s4330_s0] sm:$0x3]  ;;  %s4725_s0 = scalar_lea.vmem [#allocation15], %s4284_s25 }
 0xa46   : > { %v1961_v7 = vrot.slane %v1956_v6, %v1018_v57 }
 0xa47   : > { %1902 = vadd.xlane.f32.xlu0 %v1897_v9 }
 0xa48   : > { %2915 = vmatpush3.bf16.msra.mxu0 %v3258_v3 }
 0xa49   : > { %2916 = vmatprep.subr.bf16.mxu0 %v3259_v4 }
 0xa4c   : > { %2917 = vmatpush3.bf16.msra.mxu0 %v3260_v5 }
 0xad2   : > { %v1901_v14 = vpop.xlane.xlu1 %1900 }
 0xad3   : > { %v1905_v15 = vmul.f32 0.0078125, %v1901_v14 }
 0xad4   : > { %v1903_v16 = vpop.xlane.xlu0 %1902 }
 0xad5   : > { %v1907_v49 = vsub.f32 %v1896_v8, %v1905_v15  ;;  %v1906_v50 = vmul.f32 0.0078125, %v1903_v16  ;;  %v1965_v8 = vrot.slane %v1956_v6, %v1022_v59 }
 0xad7   : > { %v1908_v18 = vsub.f32 %v1897_v9, %v1906_v50  ;;  %v1909_v17 = vmul.f32 %v1907_v49, %v1907_v49 }
 0xad9   : > { %1911 = vadd.xlane.f32.xlu0 %v1909_v17  ;;  %v1910_v20 = vmul.f32 %v1908_v18, %v1908_v18 }
 0xadd   : > { %1913 = vadd.xlane.f32.xlu0 %v1910_v20 }
 0xb66   : > { %v1912_v36 = vpop.xlane.xlu0 %1911 }
 0xb67   : > { %v1915_v37 = vmul.f32 0.0078125, %v1912_v36 }
 0xb69   : > { %v1917_v38 = vadd.f32 1e-12, %v1915_v37 }
 0xb6a   : > { %v1914_v39 = vpop.xlane.xlu0 %1913 }
 0xb6b   : > { %3293 = vrsqrt.f32 %v1917_v38  ;;  %v1916_v28 = vmul.f32 0.0078125, %v1914_v39 }
 0xb6d   : > { %v1918_v40 = vadd.f32 1e-12, %v1916_v28 }
 0xb6f   : > { %3295 = vrsqrt.f32 %v1918_v40 }
 0xb75   : > { %v3294_v41 = vpop.eup %3293 }
 0xb76   : > { %v1921_v42 = vmul.f32 %v3294_v41, %v1907_v49 }
 0xb78   : > { %v1929_v45 = vmul.f32 %v2814_v43, %v1921_v42 }
 0xb79   : > { %v3296_v44 = vpop.eup %3295 }
 0xb7a   : > { %v1922_v23 = vmul.f32 %v3296_v44, %v1908_v18  ;;  %v4535_v48 = vadd.f32 %v2815_v46, %v1929_v45 }
 0xb7c   : > { %v1930_v47 = vmul.f32 %v2814_v43, %v1922_v23 }
 0xb7e   : > { %v4537_v51 = vadd.f32 %v2815_v46, %v1930_v47 }
 0xb80   : > { %v1939_v52 = vpack.c.bf16 %v4537_v51, %v4535_v48 }
 0xb82   : > { %2081 = vmatmul.mubr.bf16.vlgmr.msra.gmra.mrb[28].mxu1 %v1939_v52 }
 0xc55   : > { %v2082_v9 = vpop.f32.mrb[28].mxu1 }
 0xc56   : > { %v2083_v10 = vadd.f32 %v2082_v9, %v1961_v7  ;;  %v2084_v11 = vpop.f32.mrb[29].mxu1 }
 0xc57   : > { %v2085_v12 = vadd.f32 %v2084_v11, %v1965_v8  ;;  %v2086_v13 = vpop.f32.mrb[30].mxu1 }
 0xc58   : > { %v2095_v14 = vmul.f32 0.044715, %v2083_v10  ;;  %v2087_v15 = vadd.f32 %v2086_v13, %v1961_v7  ;;  %v2088_v16 = vpop.f32.mrb[31].mxu1  ;;  %v2091_v41 = vmul.f32 0.5, %v2083_v10 }
 0xc59   : > { %v2096_v49 = vmul.f32 0.044715, %v2085_v12  ;;  %v2089_v50 = vadd.f32 %v2088_v16, %v1965_v8  ;;  %v2092_v44 = vmul.f32 0.5, %v2085_v12 }
 0xc5a   : > { %v2099_v18 = vmul.f32 %v2095_v14, %v2083_v10  ;;  %v2097_v17 = vmul.f32 0.044715, %v2087_v15  ;;  %v2093_v42 = vmul.f32 0.5, %v2087_v15 }
 0xc5b   : > { %v2100_v20 = vmul.f32 %v2096_v49, %v2085_v12  ;;  %v2098_v21 = vmul.f32 0.044715, %v2089_v50  ;;  %v2094_v23 = vmul.f32 0.5, %v2089_v50  ;;  %v2849_v49 = vld [vmem:[%s4725_s0] ss:$0 sm:$0xff] }
 0xc5c   : > { %v2103_v22 = vmul.f32 %v2099_v18, %v2083_v10  ;;  %v2101_v24 = vmul.f32 %v2097_v17, %v2087_v15  ;;  %v2850_v17 = vld [vmem:[%s4726_s28] ss:$0 sm:$0xff] }
 0xc5d   : > { %v2104_v57 = vmul.f32 %v2100_v20, %v2085_v12  ;;  %v2102_v25 = vmul.f32 %v2098_v21, %v2089_v50 }
 0xc5e   : > { %v2107_v56 = vadd.f32 %v2103_v22, %v2083_v10  ;;  %v2105_v59 = vmul.f32 %v2101_v24, %v2087_v15 }
 0xc5f   : > { %v2106_v26 = vmul.f32 %v2102_v25, %v2089_v50  ;;  %v2108_v27 = vadd.f32 %v2104_v57, %v2085_v12  ;;  %v3309_v25 = vld [vmem:[#allocation17] sm:$0xff] (!%p2851_p2)  }
 0xc60   : > { %v2111_v30 = vmul.f32 0.7978846, %v2107_v56  ;;  %v2109_v31 = vadd.f32 %v2105_v59, %v2087_v15  ;;  %v3775_v56 = vmov (!%p2851_p2), 0.0   ;;  %v3310_v59 = vld [vmem:[#allocation17 + $0x8] sm:$0xff] (!%p2851_p2)  }
 0xc61   : > { %v2110_v32 = vadd.f32 %v2106_v26, %v2089_v50  ;;  %v2112_v33 = vmul.f32 0.7978846, %v2108_v27  ;;  %3021 = vmatprep.subr.bf16.mxu0 (!%p2851_p2), %v3775_v56  ;;  %v3311_v26 = vld [vmem:[#allocation17 + $0x10] sm:$0xff] (!%p2851_p2)   ;;  %v3312_v27 = vld [vmem:[#allocation17 + $0x18] sm:$0xff] (!%p2851_p2)  }
 0xc62   : > { %3297 = vtanh.f32 %v2111_v30  ;;  %v2113_v34 = vmul.f32 0.7978846, %v2109_v31  ;;  %v3313_v30 = vld [vmem:[#allocation17 + $0x20] sm:$0xff] (!%p2851_p2)   ;;  %v3314_v31 = vld [vmem:[#allocation17 + $0x28] sm:$0xff] (!%p2851_p2)  }
 0xc63   : > { %v2114_v35 = vmul.f32 0.7978846, %v2110_v32  ;;  %3299 = vtanh.f32 %v2112_v33  ;;  %v3315_v33 = vld [vmem:[#allocation17 + $0x30] sm:$0xff] (!%p2851_p2)  }
 0xc64   : > { %3301 = vtanh.f32 %v2113_v34 }
 0xc65   : > { %3303 = vtanh.f32 %v2114_v35 }
 0xc6c   : > { %v3298_v36 = vpop.eup %3297 }
 0xc6d   : > { %v3300_v37 = vpop.eup %3299  ;;  %v2119_v38 = vadd.f32 1.0, %v3298_v36  ;;  %v3316_v36 = vld [vmem:[#allocation17 + $0x38] sm:$0xff] (!%p2851_p2)  }
 0xc6e   : > { %v3302_v39 = vpop.eup %3301  ;;  %v2120_v28 = vadd.f32 1.0, %v3300_v37 }
 0xc6f   : > { %v3304_v40 = vpop.eup %3303  ;;  %v2121_v43 = vadd.f32 1.0, %v3302_v39  ;;  %v2123_v46 = vmul.f32 %v2119_v38, %v2091_v41  ;;  %v2852_v39 = vld [vmem:[#allocation18] ss:$0 sm:$0xff] (!%p2851_p2) }
 0xc70   : > { %v2122_v45 = vadd.f32 1.0, %v3304_v40  ;;  %v2124_v52 = vmul.f32 %v2120_v28, %v2092_v44 }
 0xc71   : > { %v2125_v47 = vmul.f32 %v2121_v43, %v2093_v42 }
 0xc72   : > { %v2126_v19 = vmul.f32 %v2122_v45, %v2094_v23 }
 0xc73   : > { %v2127_v53 = vpack.c.bf16 %v2125_v47, %v2123_v46 }
 0xc74   : > { %v2128_v54 = vpack.c.bf16 %v2126_v19, %v2124_v52 }
 0xc76   : > { %2296 = vmatprep.mubr.bf16.mxu0 %v2128_v54 }
 0xc77   : > { %2297 = vmatmul.mubr.bf16.vlgmr.msra.gmra.mrb[16].mxu0 %v2127_v53 }
 0xc78   : > { %3022 = vmatpush3.bf16.msra.mxu0 (!%p2851_p2), %v3309_v25  ;;  %3037 = vmatprep.mubr.msk.bf16.mxu0 (!%p2851_p2), %vm3776_vm6, %v3775_v56 }
 0xc79   : > { %3023 = vmatprep.subr.bf16.mxu0 (!%p2851_p2), %v3775_v56 }
 0xc7c   : > { %3024 = vmatpush3.bf16.msra.mxu0 (!%p2851_p2), %v3310_v59 }
 0xc7d   : > { %3025 = vmatprep.subr.bf16.mxu0 (!%p2851_p2), %v3775_v56 }
 0xc80   : > { %3026 = vmatpush3.bf16.msra.mxu0 (!%p2851_p2), %v3311_v26 }
 0xc81   : > { %3027 = vmatprep.subr.bf16.mxu0 (!%p2851_p2), %v3775_v56 }
 0xc84   : > { %3028 = vmatpush3.bf16.msra.mxu0 (!%p2851_p2), %v3312_v27 }
 0xc85   : > { %3029 = vmatprep.subr.bf16.mxu0 (!%p2851_p2), %v3775_v56 }
 0xc88   : > { %3030 = vmatpush3.bf16.msra.mxu0 (!%p2851_p2), %v3313_v30 }
 0xc89   : > { %3031 = vmatprep.subr.bf16.mxu0 (!%p2851_p2), %v3775_v56 }
 0xc8c   : > { %3032 = vmatpush3.bf16.msra.mxu0 (!%p2851_p2), %v3314_v31 }
 0xc8d   : > { %3033 = vmatprep.subr.bf16.mxu0 (!%p2851_p2), %v3775_v56 }
 0xc90   : > { %3034 = vmatpush3.bf16.msra.mxu0 (!%p2851_p2), %v3315_v33 }
 0xc91   : > { %3035 = vmatprep.subr.bf16.mxu0 (!%p2851_p2), %v3775_v56 }
 0xc94   : > { %3036 = vmatpush3.bf16.msra.mxu0 (!%p2851_p2), %v3316_v36 }
 0xd4a   : > { %v2918_v55 = vpop.f32.mrb[16].mxu0 }
 0xd4b   : > { %v2919_v60 = vpop.f32.mrb[17].mxu0 }
 0xd4c   : > { %v2920_v29 = vadd.f32 %v2919_v60, %v2918_v55  ;;  %v2921_v61 = vpop.f32.mrb[18].mxu0 }
 0xd4d   : > { %v2922_v62 = vpop.f32.mrb[19].mxu0 }
 0xd4e   : > { %v2299_v63 = vadd.f32 %v2920_v29, %v2832_v58  ;;  %v2923_v0 = vadd.f32 %v2922_v62, %v2921_v61 }
 0xd50   : > { %v2302_v1 = vadd.f32 %v2923_v0, %v2832_v58  ;;  %v2305_v2 = vadd.f32 %v2299_v63, %v4535_v48 }
 0xd52   : > { %2309 = vadd.xlane.f32.xlu1 %v2305_v2  ;;  %v2306_v3 = vadd.f32 %v2302_v1, %v4537_v51 }
 0xd54   : > { %2311 = vadd.xlane.f32.xlu0 %v2306_v3 }
 0xddf   : > { %v2310_v4 = vpop.xlane.xlu1 %2309 }
 0xde0   : > { %v2313_v5 = vmul.f32 0.0078125, %v2310_v4 }
 0xde1   : > { %v2312_v6 = vpop.xlane.xlu0 %2311 }
 0xde2   : > { %v2315_v7 = vsub.f32 %v2305_v2, %v2313_v5  ;;  %v2314_v8 = vmul.f32 0.0078125, %v2312_v6 }
 0xde4   : > { %v2316_v9 = vsub.f32 %v2306_v3, %v2314_v8  ;;  %v2317_v10 = vmul.f32 %v2315_v7, %v2315_v7 }
 0xde6   : > { %2319 = vadd.xlane.f32.xlu1 %v2317_v10  ;;  %v2318_v11 = vmul.f32 %v2316_v9, %v2316_v9 }
 0xde8   : > { %2321 = vadd.xlane.f32.xlu0 %v2318_v11 }
 0xe73   : > { %v2320_v12 = vpop.xlane.xlu1 %2319 }
 0xe74   : > { %v2323_v13 = vmul.f32 0.0078125, %v2320_v12 }
 0xe75   : > { %v2322_v14 = vpop.xlane.xlu0 %2321 }
 0xe76   : > { %v2325_v48 = vadd.f32 1e-12, %v2323_v13  ;;  %v2324_v15 = vmul.f32 0.0078125, %v2322_v14 }
 0xe78   : > { %3305 = vrsqrt.f32 %v2325_v48  ;;  %v2326_v51 = vadd.f32 1e-12, %v2324_v15 }
 0xe7a   : > { %3307 = vrsqrt.f32 %v2326_v51 }
 0xe82   : > { %v3306_v16 = vpop.eup %3305 }
 0xe83   : > { %v2329_v50 = vmul.f32 %v3306_v16, %v2315_v7 }
 0xe84   : > { %v3308_v18 = vpop.eup %3307 }
 0xe85   : > { %v2337_v20 = vmul.f32 %v2849_v49, %v2329_v50  ;;  %v2330_v21 = vmul.f32 %v3308_v18, %v2316_v9  ;;  %2352 = sbr.rel (%p2851_p2) target bundleno = 3962 (0xf7a), region = 148 }
 0xe87   : > { %v2345_v22 = vadd.f32 %v2850_v17, %v2337_v20  ;;  %v2338_v24 = vmul.f32 %v2849_v49, %v2330_v21 }
 0xe89   : > { %2347 = vst [vmem:[#allocation2] sm:$0xff] %v2345_v22  ;;  %v2346_v57 = vadd.f32 %v2850_v17, %v2338_v24 }
 0xe8b   : > { %2348 = vst [vmem:[#allocation2 + $0x8] sm:$0xff] %v2346_v57 }
 0xe90   : > { %v2353_v35 = vld [vmem:[#allocation2] sm:$0x1] }
 0xe92   : > { %v2354_v32 = vld [vmem:[#allocation2 + $0x8] sm:$0x1] }
 0xe93   : > { %v2356_v34 = vrot.slane %v2354_v32, 7 }
 0xe95   : > { %v2359_v37 = vsel %vm2358_vm7, %v2353_v35, %v2356_v34 }
 0xe96   : > { %v2360_v38 = vpack.c.bf16 %v2359_v37, %v2359_v37 }
 0xe98   : > { %3038 = vmatmul.mubr.bf16.vlgmr.msra.gmra.mrb[0].mxu0 %v2360_v38 }
 0xf6b   : > { %v2466_v28 = vpop.f32.mrb[0].mxu0 }
 0xf6c   : > { %v2467_v40 = vadd.f32 %v2852_v39, %v2466_v28  ;;  %v3039_v41 = vpop.f32.mrb[1].mxu0 }
 0xf6d   : > { %v2469_v42 = vpop.f32.mrb[2].mxu0 }
 0xf6e   : > { %3317 = vtanh.f32 %v2467_v40  ;;  %v3040_v43 = vpop.f32.mrb[3].mxu0 }
 0xf78   : > { %v3318_v44 = vpop.eup %3317 }
 0xf79   : > { %2473 = vst [vmem:[#allocation20] sm:$0x3] %v3318_v44 }
 0xf7a PF: > { %s4728_s25 = sld [smem:[#allocation29_spill]]  ;;  %s3777_s2 = smov [#allocation20]  }
 0xf7b   : > { %s2481_s24 = sshll.u32 %s3777_s2, 4  ;;  %s2482_s24 = int_to_ptr.vmem [resolvable:$true] %s2481_s24 }
 0xf7c   : > { %s3671_s4 = scalar_lea.vmem %s2482_s24, 32  ;;  %p3678_p8 = scmp.lt.s32.totalorder %s2482_s24, %s2482_s24 }
 0xf7d   : > { %p3672_p9 = scmp.ne.s32.totalorder %s2482_s24, %s3671_s4  ;;  %p3679_p3 = scmp.lt.s32.totalorder %s3671_s4, %s3671_s4 }
 0xf7f   : > { %p3680_p6 = por %p3679_p3, %p3678_p8 }
 0xf80   : > { %p3126_p4 = scmp.eq.s32.totalorder %s4728_s25, 1 }
 0xf82   : > { %p3673_p10 = pnand %p3672_p9, %p3126_p4 }
 0xf84   : > { %p3674_p13 = pneg %p3673_p10 }
 0xf86   : > { %p3681_p11 = pnand %p3680_p6, %p3674_p13 }
 0xf88   : > { %3684 = shalt.err (!%p3681_p11)
}
 0xf89   : > { %s4729_s9 = sld [smem:[#allocation45_spill]] }
 0xf8f   : > { %s3685_s10 = scalar_lea.hbm %s4729_s9, 32 }
 0xf90   : > { %p3686_p7 = scmp.ne.s32.totalorder %s4729_s9, %s3685_s10  ;;  %p3691_p0 = scmp.lt.u32.totalorder %s3685_s10, %s4729_s9 }
 0xf92   : > { %p3687_p1 = pnand %p3686_p7, %p3126_p4 }
 0xf94   : > { %p3688_p5 = pneg %p3687_p1 }
 0xf96   : > { %p3693_p12 = pnand %p3691_p0, %p3688_p5 }
 0xf98   : > { %3696 = shalt.err (!%p3693_p12)
}
 0xf99   : > { %3076 = dma.vmem_to_hbm [thread:$0]  (%p3126_p4), %s2482_s24, 32, %s4729_s9, [#allocation6]  }
 0xf9a   : > { %3734 = dma.done.wait (%p3126_p4), [#allocation6], 32  }
 0xf9b   : > { %3736 = vsyncadd (%p3126_p4), [#allocation6], 4294967264 }
 0xf9c PF: > { %s4730_s30 = sld [smem:[#allocation30_spill]]  ;;  %s4731_s27 = sld [smem:[#allocation27_spill]] }
 0xf9d   : > { %s4732_s28 = sld [smem:[#allocation28_spill]]  ;;  %s4733_s29 = sld [smem:[#allocation31_spill]] }
 0xfa2   : > { %p29_p2 = scmp.ge.s32.totalorder %s4730_s30, 4  }
 0xfa4   :  { %31 = sbr.rel (!%p29_p2) target bundleno = 19 (0x13), region = 241 }
 0xfab   :  { %2494 = vsyncpa [#allocation5], 1 }
 0xfac   :  { %2496 = vsyncpa [#allocation5 + $0x1], 1 }
 0xfad   :  { %2497 = vsyncpa [#allocation8], 1 }
 0xfae   :  { %2498 = vsyncpa [#allocation19], 1 }
 0xfaf   :  { %2499 = vsyncpa [#allocation6], 1 }
 0xfb0   :  { %2501 = vsyncpa [#allocation6 + $0x1], 1 }

</bundles_post_ra>
